<compile_context>
chip_gen: v7x
topology: tpu7x:2x2x1
jax: 0.10.0
libtpu: 0.0.40
codegen_flags: <defaults>
</compile_context>

<pallas_src>
import functools

import jax
import jax.numpy as jnp
from jax import lax
from jax.experimental import pallas as pl
from jax.experimental.pallas import tpu as pltpu


# --------------------------------------------------------------------------
# Helpers
# --------------------------------------------------------------------------
def _shift_flat(h, s):
    """shifted[:, p] = h[:, p + s] if 0 <= p + s < M, else 0 (zero-fill)."""
    if s == 0:
        return h
    C, M = h.shape
    if s > 0:
        pad = jnp.zeros((C, s), h.dtype)
        return jnp.concatenate([h[:, s:], pad], axis=1)
    pad = jnp.zeros((C, -s), h.dtype)
    return jnp.concatenate([pad, h[:, :M + s]], axis=1)


# --------------------------------------------------------------------------
# Pallas kernel (channel-major: activations are (C, M) slabs, M = H*W)
# --------------------------------------------------------------------------
def _bottleneck_kernel(x_ref,
                       s_m1, t_m1, w_c1, b_c1,
                       s_m2, t_m2, w_c3, b_c3,
                       s_m3, t_m3, w_c4, b_c4,
                       s_p, t_p, w_p, b_p,
                       o_ref, *, H, W, matmul_dtype):
    M = H * W
    x = x_ref[0].astype(jnp.float32)                      # (Cin, M)

    def mm(w, a):
        # MXU matmul; operands optionally cast to bf16, accumulate in f32.
        return jnp.dot(w.astype(matmul_dtype), a.astype(matmul_dtype),
                       preferred_element_type=jnp.float32)

    # ---------------- main branch ----------------
    h = jnp.maximum(x * s_m1[...] + t_m1[...], 0.0)        # BN1 + ReLU     (Cin, M)
    h = mm(w_c1[...], h) + b_c1[...]                       # 1x1 conv       (ncp, M)
    h = jnp.maximum(h * s_m2[...] + t_m2[...], 0.0)        # BN2 + ReLU     (ncp, M)

    # ----- 3x3 conv (pad=1) as zero-fill shifts + col masks + one matmul -----
    # Column masks, computed once (hoisted out of the tap loop).  Zero-fill
    # shifting already zeroes the taps that fall off the top/bottom rows.
    col = lax.broadcasted_iota(jnp.int32, (1, M), 1) % W
    col_ok = {-1: col >= 1, 0: None, 1: col <= W - 2}

    taps = []
    for dy in (-1, 0, 1):
        for dx in (-1, 0, 1):
            shifted = _shift_flat(h, dy * W + dx)          # (ncp, M)
            mask = col_ok[dx]
            if mask is not None:
                shifted = jnp.where(mask, shifted, 0.0)
            taps.append(shifted)
    im2col = jnp.concatenate(taps, axis=0)                 # (9*ncp, M), sublane-aligned
    h = mm(w_c3[...], im2col) + b_c3[...]                  # 3x3 conv       (ncp, M)

    h = jnp.maximum(h * s_m3[...] + t_m3[...], 0.0)        # BN3 + ReLU
    main = mm(w_c4[...], h) + b_c4[...]                    # 1x1 conv       (4nc, M)

    # ---------------- projection branch ----------------
    p = jnp.maximum(x * s_p[...] + t_p[...], 0.0)          # BN + ReLU
    proj = mm(w_p[...], p) + b_p[...]                      # 1x1 conv       (4nc, M)

    o_ref[0] = (main + proj).astype(o_ref.dtype)


# --------------------------------------------------------------------------
# Wrapper (NCHW in / NCHW out; reshapes are free in channel-major layout)
# --------------------------------------------------------------------------
_PARAM_ORDER = ["s_m1", "t_m1", "w_c1", "b_c1",
                "s_m2", "t_m2", "w_c3", "b_c3",
                "s_m3", "t_m3", "w_c4", "b_c4",
                "s_p", "t_p", "w_p", "b_p"]


def bottleneck_transition(x_nchw, params, *, matmul_dtype=jnp.float32):
    N, Cin, H, W = x_nchw.shape
    M = H * W
    Cout = params["w_p"].shape[0]

    # NCHW is already channel-major: (N, Cin, H, W) -> (N, Cin, M) is free.
    x = x_nchw.reshape(N, Cin, M)

    in_specs = [pl.BlockSpec((1, Cin, M), lambda b: (b, 0, 0))]
    args = [x]
    for name in _PARAM_ORDER:
        p = params[name]
        in_specs.append(pl.BlockSpec(p.shape, lambda b: (0, 0)))
        args.append(p)

    out = pl.pallas_call(
        functools.partial(_bottleneck_kernel, H=H, W=W,
                          matmul_dtype=matmul_dtype),
        out_shape=jax.ShapeDtypeStruct((N, Cout, M), x_nchw.dtype),
        grid=(N,),
        in_specs=in_specs,
        out_specs=pl.BlockSpec((1, Cout, M), lambda b: (b, 0, 0)),
        compiler_params=pltpu.CompilerParams(
            dimension_semantics=("parallel",),
            vmem_limit_bytes=64 * 1024 * 1024),
    )(*args)

    # (N, Cout, M) -> NCHW, also free.
    return out.reshape(N, Cout, H, W)


# --------------------------------------------------------------------------
# Deterministic parameter construction (shapes from the module __init__)
# --------------------------------------------------------------------------
def make_raw_params(key, in_channels, nc):
    keys = list(jax.random.split(key, 24))
    it = iter(keys)

    def bn_raw(C):
        g = jax.random.uniform(next(it), (C,), jnp.float32, 0.5, 1.5)
        b = jax.random.normal(next(it), (C,), jnp.float32) * 0.1
        m = jax.random.normal(next(it), (C,), jnp.float32) * 0.1
        v = jax.random.uniform(next(it), (C,), jnp.float32, 0.5, 1.5)
        return (g, b, m, v)

    def conv_raw(co, ci, k):
        w = jax.random.normal(next(it), (co, ci, k, k), jnp.float32)
        w = w * (1.0 / (ci * k * k) ** 0.5)
        b = jax.random.normal(next(it), (co,), jnp.float32) * 0.1
        return w, b

    raw = {}
    raw["bn_m1"] = bn_raw(in_channels)
    raw["w1"], raw["b1"] = conv_raw(nc, in_channels, 1)
    raw["bn_m2"] = bn_raw(nc)
    raw["w3"], raw["b3"] = conv_raw(nc, nc, 3)
    raw["bn_m3"] = bn_raw(nc)
    raw["w4"], raw["b4"] = conv_raw(4 * nc, nc, 1)
    raw["bn_p"] = bn_raw(in_channels)
    raw["wp"], raw["bp"] = conv_raw(4 * nc, in_channels, 1)
    return raw


def fold_params(raw, eps=1e-5):
    """Fold eval-mode BN into per-channel scale/shift (column vectors for the
    channel-major kernel), reshape 1x1 conv weights to (Cout, Cin) matrices,
    build the 3x3 conv as a tap-major (ncp, 9*ncp) im2col matrix, and pad the
    intermediate channel count nc up to a sublane multiple (8)."""
    def bn_fold(g, b, m, v):
        scale = g / jnp.sqrt(v + eps)
        shift = b - m * scale
        return scale[:, None], shift[:, None]

    def pad_rows(a, n, value=0.0):
        if a.shape[0] == n:
            return a
        pad = jnp.full((n - a.shape[0],) + a.shape[1:], value, a.dtype)
        return jnp.concatenate([a, pad], axis=0)

    nc = raw["w1"].shape[0]
    ncp = -(-nc // 8) * 8                                  # sublane-aligned nc

    p = {}
    # BN1 on x (Cin channels)
    p["s_m1"], p["t_m1"] = bn_fold(*raw["bn_m1"])
    # conv 1x1: (ncp, Cin), padded output channels are zero
    p["w_c1"] = pad_rows(raw["w1"][:, :, 0, 0], ncp)
    p["b_c1"] = pad_rows(raw["b1"][:, None], ncp)
    # BN2: padded channels get scale=1, shift=0 so they stay exactly zero
    s, t = bn_fold(*raw["bn_m2"])
    p["s_m2"] = pad_rows(s, ncp, value=1.0)
    p["t_m2"] = pad_rows(t, ncp)
    # 3x3 conv -> single im2col matmul weight (ncp, 9*ncp); tap-major blocks
    w3 = raw["w3"]                                         # (out, in, ky, kx)
    w3m = jnp.zeros((ncp, 9 * ncp), jnp.float32)
    for k in range(9):
        ky, kx = k // 3, k % 3
        w3m = w3m.at[:nc, k * ncp:k * ncp + nc].set(w3[:, :, ky, kx])
    p["w_c3"] = w3m
    p["b_c3"] = pad_rows(raw["b3"][:, None], ncp)
    # BN3
    s, t = bn_fold(*raw["bn_m3"])
    p["s_m3"] = pad_rows(s, ncp, value=1.0)
    p["t_m3"] = pad_rows(t, ncp)
    # conv 1x1 to 4nc: (4nc, ncp), padded input columns zero
    w4 = raw["w4"][:, :, 0, 0]
    p["w_c4"] = jnp.concatenate(
        [w4, jnp.zeros((w4.shape[0], ncp - nc), jnp.float32)], axis=1) \
        if ncp != nc else w4
    p["b_c4"] = raw["b4"][:, None]
    # projection branch
    p["s_p"], p["t_p"] = bn_fold(*raw["bn_p"])
    p["w_p"] = raw["wp"][:, :, 0, 0]                       # (4nc, Cin)
    p["b_p"] = raw["bp"][:, None]
    return p


# --------------------------------------------------------------------------
# Pure-JAX reference (NCHW, eval-mode BN) for correctness verification
# --------------------------------------------------------------------------
def reference(x, raw, eps=1e-5):
    def bn(z, g, b, m, v):
        return ((z - m[None, :, None, None])
                / jnp.sqrt(v[None, :, None, None] + eps)
                * g[None, :, None, None] + b[None, :, None, None])

    def conv(z, w, b, pad):
        y = lax.conv_general_dilated(
            z, w, window_strides=(1, 1), padding=[(pad, pad), (pad, pad)],
            dimension_numbers=("NCHW", "OIHW", "NCHW"))
        return y + b[None, :, None, None]

    relu = lambda z: jnp.maximum(z, 0.0)
    h = relu(bn(x, *raw["bn_m1"]))
    h = conv(h, raw["w1"], raw["b1"], 0)
    h = relu(bn(h, *raw["bn_m2"]))
    h = conv(h, raw["w3"], raw["b3"], 1)
    h = relu(bn(h, *raw["bn_m3"]))
    main = conv(h, raw["w4"], raw["b4"], 0)

    p = relu(bn(x, *raw["bn_p"]))
    proj = conv(p, raw["wp"], raw["bp"], 0)
    return proj + main


# --------------------------------------------------------------------------
if __name__ == "__main__":
    key = jax.random.PRNGKey(0)
    k_params, k_x = jax.random.split(key)

    N, Cin, H, W = 2, 4, 16, 16
    nc = 4

    raw = make_raw_params(k_params, Cin, nc)
    params = fold_params(raw)
    x = jax.random.normal(k_x, (N, Cin, H, W), jnp.float32)

    ref = reference(x, raw)

    # Exact-path check (f32 MXU operands) — tight tolerance.
    out = jax.block_until_ready(
        bottleneck_transition(x, params, matmul_dtype=jnp.float32))
    assert out.shape == (N, 4 * nc, H, W)
    err = jnp.max(jnp.abs(out - ref))
    assert jnp.allclose(out, ref, atol=1e-4, rtol=1e-4), f"f32 max abs err={err}"

    # bf16 MXU fast path — looser tolerance (operand rounding only; f32 accum).
    out_bf16 = jax.block_until_ready(
        bottleneck_transition(x, params, matmul_dtype=jnp.bfloat16))
    err_bf16 = jnp.max(jnp.abs(out_bf16 - ref))
    assert jnp.allclose(out_bf16, ref, atol=3e-1, rtol=1e-1), \
        f"bf16 max abs err={err_bf16}"

    print("KERNEL_OK")
</pallas_src>

<mosaic_0001>
module attributes {stable_mosaic.version = 11 : i64} {
  func.func @_bottleneck_kernel(%arg0: i32, %arg1: memref<1x4x256xf32, #tpu.memory_space<vmem>>, %arg2: memref<4x1xf32, #tpu.memory_space<vmem>>, %arg3: memref<4x1xf32, #tpu.memory_space<vmem>>, %arg4: memref<8x4xf32, #tpu.memory_space<vmem>>, %arg5: memref<8x1xf32, #tpu.memory_space<vmem>>, %arg6: memref<8x1xf32, #tpu.memory_space<vmem>>, %arg7: memref<8x1xf32, #tpu.memory_space<vmem>>, %arg8: memref<8x72xf32, #tpu.memory_space<vmem>>, %arg9: memref<8x1xf32, #tpu.memory_space<vmem>>, %arg10: memref<8x1xf32, #tpu.memory_space<vmem>>, %arg11: memref<8x1xf32, #tpu.memory_space<vmem>>, %arg12: memref<16x8xf32, #tpu.memory_space<vmem>>, %arg13: memref<16x1xf32, #tpu.memory_space<vmem>>, %arg14: memref<4x1xf32, #tpu.memory_space<vmem>>, %arg15: memref<4x1xf32, #tpu.memory_space<vmem>>, %arg16: memref<16x4xf32, #tpu.memory_space<vmem>>, %arg17: memref<16x1xf32, #tpu.memory_space<vmem>>, %arg18: memref<1x16x256xf32, #tpu.memory_space<vmem>>) attributes {dimension_semantics = [#tpu.dimension_semantics<parallel>], iteration_bounds = array<i64: 2>, scalar_prefetch = 0 : i64, scratch_operands = 0 : i64, tpu.core_type = #tpu.core_type<tc>, window_params = [{transform_indices = @transform_0, window_bounds = array<i64: 1, 4, 256>}, {pipeline_mode = #tpu.pipeline_mode<synchronous>, transform_indices = @transform_1, window_bounds = array<i64: 4, 1>}, {pipeline_mode = #tpu.pipeline_mode<synchronous>, transform_indices = @transform_2, window_bounds = array<i64: 4, 1>}, {pipeline_mode = #tpu.pipeline_mode<synchronous>, transform_indices = @transform_3, window_bounds = array<i64: 8, 4>}, {pipeline_mode = #tpu.pipeline_mode<synchronous>, transform_indices = @transform_4, window_bounds = array<i64: 8, 1>}, {pipeline_mode = #tpu.pipeline_mode<synchronous>, transform_indices = @transform_5, window_bounds = array<i64: 8, 1>}, {pipeline_mode = #tpu.pipeline_mode<synchronous>, transform_indices = @transform_6, window_bounds = array<i64: 8, 1>}, {pipeline_mode = #tpu.pipeline_mode<synchronous>, transform_indices = @transform_7, window_bounds = array<i64: 8, 72>}, {pipeline_mode = #tpu.pipeline_mode<synchronous>, transform_indices = @transform_8, window_bounds = array<i64: 8, 1>}, {pipeline_mode = #tpu.pipeline_mode<synchronous>, transform_indices = @transform_9, window_bounds = array<i64: 8, 1>}, {pipeline_mode = #tpu.pipeline_mode<synchronous>, transform_indices = @transform_10, window_bounds = array<i64: 8, 1>}, {pipeline_mode = #tpu.pipeline_mode<synchronous>, transform_indices = @transform_11, window_bounds = array<i64: 16, 8>}, {pipeline_mode = #tpu.pipeline_mode<synchronous>, transform_indices = @transform_12, window_bounds = array<i64: 16, 1>}, {pipeline_mode = #tpu.pipeline_mode<synchronous>, transform_indices = @transform_13, window_bounds = array<i64: 4, 1>}, {pipeline_mode = #tpu.pipeline_mode<synchronous>, transform_indices = @transform_14, window_bounds = array<i64: 4, 1>}, {pipeline_mode = #tpu.pipeline_mode<synchronous>, transform_indices = @transform_15, window_bounds = array<i64: 16, 4>}, {pipeline_mode = #tpu.pipeline_mode<synchronous>, transform_indices = @transform_16, window_bounds = array<i64: 16, 1>}, {transform_indices = @transform_17, window_bounds = array<i64: 1, 16, 256>}]} {
    %c0 = arith.constant 0 : index
    %c0_0 = arith.constant 0 : index
    %c0_1 = arith.constant 0 : index
    %0 = vector.load %arg1[%c0, %c0_0, %c0_1] : memref<1x4x256xf32, #tpu.memory_space<vmem>>, vector<1x4x256xf32>
    %1 = vector.shape_cast %0 : vector<1x4x256xf32> to vector<4x256xf32>
    %c0_2 = arith.constant 0 : index
    %c0_3 = arith.constant 0 : index
    %2 = vector.load %arg2[%c0_2, %c0_3] : memref<4x1xf32, #tpu.memory_space<vmem>>, vector<4x1xf32>
    %3 = vector.broadcast %2 : vector<4x1xf32> to vector<4x256xf32>
    %4 = arith.mulf %1, %3 : vector<4x256xf32>
    %c0_4 = arith.constant 0 : index
    %c0_5 = arith.constant 0 : index
    %5 = vector.load %arg3[%c0_4, %c0_5] : memref<4x1xf32, #tpu.memory_space<vmem>>, vector<4x1xf32>
    %6 = vector.broadcast %5 : vector<4x1xf32> to vector<4x256xf32>
    %7 = arith.addf %4, %6 : vector<4x256xf32>
    %cst = arith.constant 0.000000e+00 : f32
    %8 = vector.broadcast %cst : f32 to vector<4x256xf32>
    %9 = arith.maximumf %7, %8 : vector<4x256xf32>
    %c0_6 = arith.constant 0 : index
    %c0_7 = arith.constant 0 : index
    %10 = vector.load %arg4[%c0_6, %c0_7] : memref<8x4xf32, #tpu.memory_space<vmem>>, vector<8x4xf32>
    %cst_8 = arith.constant dense<0.000000e+00> : vector<8x256xf32>
    %11 = tpu.matmul %10, %9, %cst_8 {dimension_numbers = #tpu.dot_dimension_numbers<[1], [0], [0], [1], [0, 0, 1, 1], [], []>} : vector<8x4xf32>, vector<4x256xf32>, vector<8x256xf32> -> vector<8x256xf32>
    %c0_9 = arith.constant 0 : index
    %c0_10 = arith.constant 0 : index
    %12 = vector.load %arg5[%c0_9, %c0_10] : memref<8x1xf32, #tpu.memory_space<vmem>>, vector<8x1xf32>
    %13 = vector.broadcast %12 : vector<8x1xf32> to vector<8x256xf32>
    %14 = arith.addf %11, %13 : vector<8x256xf32>
    %c0_11 = arith.constant 0 : index
    %c0_12 = arith.constant 0 : index
    %15 = vector.load %arg6[%c0_11, %c0_12] : memref<8x1xf32, #tpu.memory_space<vmem>>, vector<8x1xf32>
    %16 = vector.broadcast %15 : vector<8x1xf32> to vector<8x256xf32>
    %17 = arith.mulf %14, %16 : vector<8x256xf32>
    %c0_13 = arith.constant 0 : index
    %c0_14 = arith.constant 0 : index
    %18 = vector.load %arg7[%c0_13, %c0_14] : memref<8x1xf32, #tpu.memory_space<vmem>>, vector<8x1xf32>
    %19 = vector.broadcast %18 : vector<8x1xf32> to vector<8x256xf32>
    %20 = arith.addf %17, %19 : vector<8x256xf32>
    %cst_15 = arith.constant 0.000000e+00 : f32
    %21 = vector.broadcast %cst_15 : f32 to vector<8x256xf32>
    %22 = arith.maximumf %20, %21 : vector<8x256xf32>
    %23 = tpu.iota {dimensions = array<i32: 1>} : vector<1x256xi32>
    %c16_i32 = arith.constant 16 : i32
    %c0_i32 = arith.constant 0 : i32
    %24 = arith.cmpi eq, %c16_i32, %c0_i32 : i32
    %c1_i32 = arith.constant 1 : i32
    %25 = arith.select %24, %c1_i32, %c16_i32 : i32
    %26 = vector.broadcast %25 : i32 to vector<1x256xi32>
    %27 = arith.remsi %23, %26 : vector<1x256xi32>
    %c0_i32_16 = arith.constant 0 : i32
    %28 = vector.broadcast %c0_i32_16 : i32 to vector<1x256xi32>
    %29 = arith.cmpi ne, %27, %28 : vector<1x256xi32>
    %c0_i32_17 = arith.constant 0 : i32
    %30 = vector.broadcast %c0_i32_17 : i32 to vector<1x256xi32>
    %31 = arith.cmpi slt, %27, %30 : vector<1x256xi32>
    %c0_i32_18 = arith.constant 0 : i32
    %32 = arith.cmpi slt, %25, %c0_i32_18 : i32
    %33 = vector.broadcast %32 : i1 to vector<1x256xi1>
    %34 = vector.broadcast %33 : vector<1x256xi1> to vector<1x256xi1>
    %35 = arith.xori %31, %34 : vector<1x256xi1>
    %36 = arith.andi %35, %29 : vector<1x256xi1>
    %37 = vector.broadcast %25 : i32 to vector<1x256xi32>
    %38 = arith.addi %27, %37 : vector<1x256xi32>
    %39 = arith.select %36, %38, %27 : vector<1x256xi1>, vector<1x256xi32>
    %c1_i32_19 = arith.constant 1 : i32
    %40 = vector.broadcast %c1_i32_19 : i32 to vector<1x256xi32>
    %41 = arith.cmpi sge, %39, %40 : vector<1x256xi32>
    %c14_i32 = arith.constant 14 : i32
    %42 = vector.broadcast %c14_i32 : i32 to vector<1x256xi32>
    %43 = arith.cmpi sle, %39, %42 : vector<1x256xi32>
    %cst_20 = arith.constant 0.000000e+00 : f32
    %44 = vector.broadcast %cst_20 : f32 to vector<8x17xf32>
    %45 = vector.extract_strided_slice %22 {offsets = [0, 0], sizes = [8, 239], strides = [1, 1]} : vector<8x256xf32> to vector<8x239xf32>
    %46 = tpu.concatenate %44, %45 in 1 : vector<8x17xf32>, vector<8x239xf32> -> vector<8x256xf32>
    %cst_21 = arith.constant 0.000000e+00 : f32
    %47 = vector.shape_cast %41 : vector<1x256xi1> to vector<1x256xi1>
    %48 = vector.broadcast %47 : vector<1x256xi1> to vector<8x256xi1>
    %49 = vector.broadcast %cst_21 : f32 to vector<8x256xf32>
    %50 = arith.select %48, %46, %49 : vector<8x256xi1>, vector<8x256xf32>
    %cst_22 = arith.constant 0.000000e+00 : f32
    %51 = vector.broadcast %cst_22 : f32 to vector<8x16xf32>
    %52 = vector.extract_strided_slice %22 {offsets = [0, 0], sizes = [8, 240], strides = [1, 1]} : vector<8x256xf32> to vector<8x240xf32>
    %53 = tpu.concatenate %51, %52 in 1 : vector<8x16xf32>, vector<8x240xf32> -> vector<8x256xf32>
    %cst_23 = arith.constant 0.000000e+00 : f32
    %54 = vector.broadcast %cst_23 : f32 to vector<8x15xf32>
    %55 = vector.extract_strided_slice %22 {offsets = [0, 0], sizes = [8, 241], strides = [1, 1]} : vector<8x256xf32> to vector<8x241xf32>
    %56 = tpu.concatenate %54, %55 in 1 : vector<8x15xf32>, vector<8x241xf32> -> vector<8x256xf32>
    %cst_24 = arith.constant 0.000000e+00 : f32
    %57 = vector.shape_cast %43 : vector<1x256xi1> to vector<1x256xi1>
    %58 = vector.broadcast %57 : vector<1x256xi1> to vector<8x256xi1>
    %59 = vector.broadcast %cst_24 : f32 to vector<8x256xf32>
    %60 = arith.select %58, %56, %59 : vector<8x256xi1>, vector<8x256xf32>
    %cst_25 = arith.constant 0.000000e+00 : f32
    %61 = vector.broadcast %cst_25 : f32 to vector<8x1xf32>
    %62 = vector.extract_strided_slice %22 {offsets = [0, 0], sizes = [8, 255], strides = [1, 1]} : vector<8x256xf32> to vector<8x255xf32>
    %63 = tpu.concatenate %61, %62 in 1 : vector<8x1xf32>, vector<8x255xf32> -> vector<8x256xf32>
    %cst_26 = arith.constant 0.000000e+00 : f32
    %64 = vector.shape_cast %41 : vector<1x256xi1> to vector<1x256xi1>
    %65 = vector.broadcast %64 : vector<1x256xi1> to vector<8x256xi1>
    %66 = vector.broadcast %cst_26 : f32 to vector<8x256xf32>
    %67 = arith.select %65, %63, %66 : vector<8x256xi1>, vector<8x256xf32>
    %cst_27 = arith.constant 0.000000e+00 : f32
    %68 = vector.broadcast %cst_27 : f32 to vector<8x1xf32>
    %69 = vector.extract_strided_slice %22 {offsets = [0, 1], sizes = [8, 255], strides = [1, 1]} : vector<8x256xf32> to vector<8x255xf32>
    %70 = tpu.concatenate %69, %68 in 1 : vector<8x255xf32>, vector<8x1xf32> -> vector<8x256xf32>
    %cst_28 = arith.constant 0.000000e+00 : f32
    %71 = vector.shape_cast %43 : vector<1x256xi1> to vector<1x256xi1>
    %72 = vector.broadcast %71 : vector<1x256xi1> to vector<8x256xi1>
    %73 = vector.broadcast %cst_28 : f32 to vector<8x256xf32>
    %74 = arith.select %72, %70, %73 : vector<8x256xi1>, vector<8x256xf32>
    %cst_29 = arith.constant 0.000000e+00 : f32
    %75 = vector.broadcast %cst_29 : f32 to vector<8x15xf32>
    %76 = vector.extract_strided_slice %22 {offsets = [0, 15], sizes = [8, 241], strides = [1, 1]} : vector<8x256xf32> to vector<8x241xf32>
    %77 = tpu.concatenate %76, %75 in 1 : vector<8x241xf32>, vector<8x15xf32> -> vector<8x256xf32>
    %cst_30 = arith.constant 0.000000e+00 : f32
    %78 = vector.shape_cast %41 : vector<1x256xi1> to vector<1x256xi1>
    %79 = vector.broadcast %78 : vector<1x256xi1> to vector<8x256xi1>
    %80 = vector.broadcast %cst_30 : f32 to vector<8x256xf32>
    %81 = arith.select %79, %77, %80 : vector<8x256xi1>, vector<8x256xf32>
    %cst_31 = arith.constant 0.000000e+00 : f32
    %82 = vector.broadcast %cst_31 : f32 to vector<8x16xf32>
    %83 = vector.extract_strided_slice %22 {offsets = [0, 16], sizes = [8, 240], strides = [1, 1]} : vector<8x256xf32> to vector<8x240xf32>
    %84 = tpu.concatenate %83, %82 in 1 : vector<8x240xf32>, vector<8x16xf32> -> vector<8x256xf32>
    %cst_32 = arith.constant 0.000000e+00 : f32
    %85 = vector.broadcast %cst_32 : f32 to vector<8x17xf32>
    %86 = vector.extract_strided_slice %22 {offsets = [0, 17], sizes = [8, 239], strides = [1, 1]} : vector<8x256xf32> to vector<8x239xf32>
    %87 = tpu.concatenate %86, %85 in 1 : vector<8x239xf32>, vector<8x17xf32> -> vector<8x256xf32>
    %cst_33 = arith.constant 0.000000e+00 : f32
    %88 = vector.shape_cast %43 : vector<1x256xi1> to vector<1x256xi1>
    %89 = vector.broadcast %88 : vector<1x256xi1> to vector<8x256xi1>
    %90 = vector.broadcast %cst_33 : f32 to vector<8x256xf32>
    %91 = arith.select %89, %87, %90 : vector<8x256xi1>, vector<8x256xf32>
    %92 = tpu.concatenate %50, %53, %60, %67, %22, %74, %81, %84, %91 in 0 : vector<8x256xf32>, vector<8x256xf32>, vector<8x256xf32>, vector<8x256xf32>, vector<8x256xf32>, vector<8x256xf32>, vector<8x256xf32>, vector<8x256xf32>, vector<8x256xf32> -> vector<72x256xf32>
    %c0_34 = arith.constant 0 : index
    %c0_35 = arith.constant 0 : index
    %93 = vector.load %arg8[%c0_34, %c0_35] : memref<8x72xf32, #tpu.memory_space<vmem>>, vector<8x72xf32>
    %cst_36 = arith.constant dense<0.000000e+00> : vector<8x256xf32>
    %94 = tpu.matmul %93, %92, %cst_36 {dimension_numbers = #tpu.dot_dimension_numbers<[1], [0], [0], [1], [0, 0, 1, 1], [], []>} : vector<8x72xf32>, vector<72x256xf32>, vector<8x256xf32> -> vector<8x256xf32>
    %c0_37 = arith.constant 0 : index
    %c0_38 = arith.constant 0 : index
    %95 = vector.load %arg9[%c0_37, %c0_38] : memref<8x1xf32, #tpu.memory_space<vmem>>, vector<8x1xf32>
    %96 = vector.broadcast %95 : vector<8x1xf32> to vector<8x256xf32>
    %97 = arith.addf %94, %96 : vector<8x256xf32>
    %c0_39 = arith.constant 0 : index
    %c0_40 = arith.constant 0 : index
    %98 = vector.load %arg10[%c0_39, %c0_40] : memref<8x1xf32, #tpu.memory_space<vmem>>, vector<8x1xf32>
    %99 = vector.broadcast %98 : vector<8x1xf32> to vector<8x256xf32>
    %100 = arith.mulf %97, %99 : vector<8x256xf32>
    %c0_41 = arith.constant 0 : index
    %c0_42 = arith.constant 0 : index
    %101 = vector.load %arg11[%c0_41, %c0_42] : memref<8x1xf32, #tpu.memory_space<vmem>>, vector<8x1xf32>
    %102 = vector.broadcast %101 : vector<8x1xf32> to vector<8x256xf32>
    %103 = arith.addf %100, %102 : vector<8x256xf32>
    %cst_43 = arith.constant 0.000000e+00 : f32
    %104 = vector.broadcast %cst_43 : f32 to vector<8x256xf32>
    %105 = arith.maximumf %103, %104 : vector<8x256xf32>
    %c0_44 = arith.constant 0 : index
    %c0_45 = arith.constant 0 : index
    %106 = vector.load %arg12[%c0_44, %c0_45] : memref<16x8xf32, #tpu.memory_space<vmem>>, vector<16x8xf32>
    %cst_46 = arith.constant dense<0.000000e+00> : vector<16x256xf32>
    %107 = tpu.matmul %106, %105, %cst_46 {dimension_numbers = #tpu.dot_dimension_numbers<[1], [0], [0], [1], [0, 0, 1, 1], [], []>} : vector<16x8xf32>, vector<8x256xf32>, vector<16x256xf32> -> vector<16x256xf32>
    %c0_47 = arith.constant 0 : index
    %c0_48 = arith.constant 0 : index
    %108 = vector.load %arg13[%c0_47, %c0_48] : memref<16x1xf32, #tpu.memory_space<vmem>>, vector<16x1xf32>
    %109 = vector.broadcast %108 : vector<16x1xf32> to vector<16x256xf32>
    %110 = arith.addf %107, %109 : vector<16x256xf32>
    %c0_49 = arith.constant 0 : index
    %c0_50 = arith.constant 0 : index
    %111 = vector.load %arg14[%c0_49, %c0_50] : memref<4x1xf32, #tpu.memory_space<vmem>>, vector<4x1xf32>
    %112 = vector.broadcast %111 : vector<4x1xf32> to vector<4x256xf32>
    %113 = arith.mulf %1, %112 : vector<4x256xf32>
    %c0_51 = arith.constant 0 : index
    %c0_52 = arith.constant 0 : index
    %114 = vector.load %arg15[%c0_51, %c0_52] : memref<4x1xf32, #tpu.memory_space<vmem>>, vector<4x1xf32>
    %115 = vector.broadcast %114 : vector<4x1xf32> to vector<4x256xf32>
    %116 = arith.addf %113, %115 : vector<4x256xf32>
    %cst_53 = arith.constant 0.000000e+00 : f32
    %117 = vector.broadcast %cst_53 : f32 to vector<4x256xf32>
    %118 = arith.maximumf %116, %117 : vector<4x256xf32>
    %c0_54 = arith.constant 0 : index
    %c0_55 = arith.constant 0 : index
    %119 = vector.load %arg16[%c0_54, %c0_55] : memref<16x4xf32, #tpu.memory_space<vmem>>, vector<16x4xf32>
    %cst_56 = arith.constant dense<0.000000e+00> : vector<16x256xf32>
    %120 = tpu.matmul %119, %118, %cst_56 {dimension_numbers = #tpu.dot_dimension_numbers<[1], [0], [0], [1], [0, 0, 1, 1], [], []>} : vector<16x4xf32>, vector<4x256xf32>, vector<16x256xf32> -> vector<16x256xf32>
    %c0_57 = arith.constant 0 : index
    %c0_58 = arith.constant 0 : index
    %121 = vector.load %arg17[%c0_57, %c0_58] : memref<16x1xf32, #tpu.memory_space<vmem>>, vector<16x1xf32>
    %122 = vector.broadcast %121 : vector<16x1xf32> to vector<16x256xf32>
    %123 = arith.addf %120, %122 : vector<16x256xf32>
    %124 = arith.addf %110, %123 : vector<16x256xf32>
    %c0_59 = arith.constant 0 : index
    %c0_60 = arith.constant 0 : index
    %c0_61 = arith.constant 0 : index
    %125 = vector.load %arg18[%c0_59, %c0_60, %c0_61] : memref<1x16x256xf32, #tpu.memory_space<vmem>>, vector<1x16x256xf32>
    %126 = vector.shape_cast %125 : vector<1x16x256xf32> to vector<16x256xf32>
    %127 = vector.shape_cast %124 : vector<16x256xf32> to vector<1x16x256xf32>
    tpu.vector_store %arg18[%c0_59, %c0_60, %c0_61], %127 {strides = array<i32>} : memref<1x16x256xf32, #tpu.memory_space<vmem>>, vector<1x16x256xf32>,
    return
  }
  func.func @transform_0(%arg0: i32) -> (i32, i32, i32) {
    %c0_i32 = arith.constant 0 : i32
    %c0_i32_0 = arith.constant 0 : i32
    %c0_i32_1 = arith.constant 0 : i32
    return %arg0, %c0_i32, %c0_i32_0 : i32, i32, i32
  }
  func.func @transform_1(%arg0: i32) -> (i32, i32) {
    %c0_i32 = arith.constant 0 : i32
    %c0_i32_0 = arith.constant 0 : i32
    %c0_i32_1 = arith.constant 0 : i32
    return %c0_i32, %c0_i32_0 : i32, i32
  }
  func.func @transform_2(%arg0: i32) -> (i32, i32) {
    %c0_i32 = arith.constant 0 : i32
    %c0_i32_0 = arith.constant 0 : i32
    %c0_i32_1 = arith.constant 0 : i32
    return %c0_i32, %c0_i32_0 : i32, i32
  }
  func.func @transform_3(%arg0: i32) -> (i32, i32) {
    %c0_i32 = arith.constant 0 : i32
    %c0_i32_0 = arith.constant 0 : i32
    %c0_i32_1 = arith.constant 0 : i32
    return %c0_i32, %c0_i32_0 : i32, i32
  }
  func.func @transform_4(%arg0: i32) -> (i32, i32) {
    %c0_i32 = arith.constant 0 : i32
    %c0_i32_0 = arith.constant 0 : i32
    %c0_i32_1 = arith.constant 0 : i32
    return %c0_i32, %c0_i32_0 : i32, i32
  }
  func.func @transform_5(%arg0: i32) -> (i32, i32) {
    %c0_i32 = arith.constant 0 : i32
    %c0_i32_0 = arith.constant 0 : i32
    %c0_i32_1 = arith.constant 0 : i32
    return %c0_i32, %c0_i32_0 : i32, i32
  }
  func.func @transform_6(%arg0: i32) -> (i32, i32) {
    %c0_i32 = arith.constant 0 : i32
    %c0_i32_0 = arith.constant 0 : i32
    %c0_i32_1 = arith.constant 0 : i32
    return %c0_i32, %c0_i32_0 : i32, i32
  }
  func.func @transform_7(%arg0: i32) -> (i32, i32) {
    %c0_i32 = arith.constant 0 : i32
    %c0_i32_0 = arith.constant 0 : i32
    %c0_i32_1 = arith.constant 0 : i32
    return %c0_i32, %c0_i32_0 : i32, i32
  }
  func.func @transform_8(%arg0: i32) -> (i32, i32) {
    %c0_i32 = arith.constant 0 : i32
    %c0_i32_0 = arith.constant 0 : i32
    %c0_i32_1 = arith.constant 0 : i32
    return %c0_i32, %c0_i32_0 : i32, i32
  }
  func.func @transform_9(%arg0: i32) -> (i32, i32) {
    %c0_i32 = arith.constant 0 : i32
    %c0_i32_0 = arith.constant 0 : i32
    %c0_i32_1 = arith.constant 0 : i32
    return %c0_i32, %c0_i32_0 : i32, i32
  }
  func.func @transform_10(%arg0: i32) -> (i32, i32) {
    %c0_i32 = arith.constant 0 : i32
    %c0_i32_0 = arith.constant 0 : i32
    %c0_i32_1 = arith.constant 0 : i32
    return %c0_i32, %c0_i32_0 : i32, i32
  }
  func.func @transform_11(%arg0: i32) -> (i32, i32) {
    %c0_i32 = arith.constant 0 : i32
    %c0_i32_0 = arith.constant 0 : i32
    %c0_i32_1 = arith.constant 0 : i32
    return %c0_i32, %c0_i32_0 : i32, i32
  }
  func.func @transform_12(%arg0: i32) -> (i32, i32) {
    %c0_i32 = arith.constant 0 : i32
    %c0_i32_0 = arith.constant 0 : i32
    %c0_i32_1 = arith.constant 0 : i32
    return %c0_i32, %c0_i32_0 : i32, i32
  }
  func.func @transform_13(%arg0: i32) -> (i32, i32) {
    %c0_i32 = arith.constant 0 : i32
    %c0_i32_0 = arith.constant 0 : i32
    %c0_i32_1 = arith.constant 0 : i32
    return %c0_i32, %c0_i32_0 : i32, i32
  }
  func.func @transform_14(%arg0: i32) -> (i32, i32) {
    %c0_i32 = arith.constant 0 : i32
    %c0_i32_0 = arith.constant 0 : i32
    %c0_i32_1 = arith.constant 0 : i32
    return %c0_i32, %c0_i32_0 : i32, i32
  }
  func.func @transform_15(%arg0: i32) -> (i32, i32) {
    %c0_i32 = arith.constant 0 : i32
    %c0_i32_0 = arith.constant 0 : i32
    %c0_i32_1 = arith.constant 0 : i32
    return %c0_i32, %c0_i32_0 : i32, i32
  }
  func.func @transform_16(%arg0: i32) -> (i32, i32) {
    %c0_i32 = arith.constant 0 : i32
    %c0_i32_0 = arith.constant 0 : i32
    %c0_i32_1 = arith.constant 0 : i32
    return %c0_i32, %c0_i32_0 : i32, i32
  }
  func.func @transform_17(%arg0: i32) -> (i32, i32, i32) {
    %c0_i32 = arith.constant 0 : i32
    %c0_i32_0 = arith.constant 0 : i32
    %c0_i32_1 = arith.constant 0 : i32
    return %arg0, %c0_i32, %c0_i32_0 : i32, i32, i32
  }
}

</mosaic_0001>

<bundles_post_ra>
// kernel: tpu_custom_call.1
= control target key start
LH: loop header
LB: loop body
LE: loop exit
PB: predicated region body
PF: predicated region fallthrough
CT: control target
= control target key end

     0   :  { %s3352_s0 = inlined_call_operand.hbm [shape: f32[2,4,256], index: 0, kind: input, shape index: {}]   ;;  %s3353_s1 = inlined_call_operand.hbm [shape: f32[4,1], index: 1, kind: input, shape index: {}]   ;;  %s3354_s2 = inlined_call_operand.hbm [shape: f32[4,1], index: 2, kind: input, shape index: {}]   ;;  %s3355_s3 = inlined_call_operand.hbm [shape: f32[8,4], index: 3, kind: input, shape index: {}]   ;;  %s3356_s4 = inlined_call_operand.hbm [shape: f32[8,1], index: 4, kind: input, shape index: {}]   ;;  %s3357_s5 = inlined_call_operand.hbm [shape: f32[8,1], index: 5, kind: input, shape index: {}]   ;;  %s3358_s6 = inlined_call_operand.hbm [shape: f32[8,1], index: 6, kind: input, shape index: {}]   ;;  %s3359_s7 = inlined_call_operand.hbm [shape: f32[8,72], index: 7, kind: input, shape index: {}]   ;;  %s3360_s8 = inlined_call_operand.hbm [shape: f32[8,1], index: 8, kind: input, shape index: {}]   ;;  %s3361_s9 = inlined_call_operand.hbm [shape: f32[8,1], index: 9, kind: input, shape index: {}]   ;;  %s3362_s10 = inlined_call_operand.hbm [shape: f32[8,1], index: 10, kind: input, shape index: {}]   ;;  %s3363_s11 = inlined_call_operand.hbm [shape: f32[16,8], index: 11, kind: input, shape index: {}]   ;;  %s3364_s12 = inlined_call_operand.hbm [shape: f32[16,1], index: 12, kind: input, shape index: {}]   ;;  %s3365_s13 = inlined_call_operand.hbm [shape: f32[4,1], index: 13, kind: input, shape index: {}]   ;;  %s3366_s14 = inlined_call_operand.hbm [shape: f32[4,1], index: 14, kind: input, shape index: {}]   ;;  %s3367_s15 = inlined_call_operand.hbm [shape: f32[16,4], index: 15, kind: input, shape index: {}]   ;;  %s3368_s16 = inlined_call_operand.hbm [shape: f32[16,1], index: 16, kind: input, shape index: {}]   ;;  %s3369_s17 = inlined_call_operand.hbm [shape: f32[2,16,256], index: 17, kind: output, shape index: {}]  }
   0x1   :  { %3385 = sst [smem:[#allocation46_spill]] %s3352_s0 }
   0x2   :  { %3386 = sst [smem:[#allocation47_spill]] %s3353_s1 }
   0x3   :  { %3387 = sst [smem:[#allocation48_spill]] %s3354_s2 }
   0x4   :  { %3388 = sst [smem:[#allocation49_spill]] %s3355_s3 }
   0x5   :  { %3389 = sst [smem:[#allocation50_spill]] %s3356_s4 }
   0x6   :  { %3390 = sst [smem:[#allocation51_spill]] %s3357_s5 }
   0x7   :  { %3391 = sst [smem:[#allocation52_spill]] %s3369_s17 }
   0x8   :  { %22 = vsyncpa [#allocation3], 0 }
   0x9   :  { %24 = vsyncpa [#allocation3 + $0x1], 0 }
   0xa   :  { %25 = vsyncpa [#allocation6], 0 }
   0xb   :  { %26 = vsyncpa [#allocation9], 0 }
   0xc   :  { %27 = vsyncpa [#allocation12], 0 }
   0xd   :  { %28 = vsyncpa [#allocation15], 0 }
   0xe   :  { %29 = vsyncpa [#allocation18], 0 }
   0xf   :  { %30 = vsyncpa [#allocation21], 0 }
  0x10   :  { %31 = vsyncpa [#allocation24], 0 }
  0x11   :  { %32 = vsyncpa [#allocation27], 0 }
  0x12   :  { %33 = vsyncpa [#allocation4], 0 }
  0x13   :  { %35 = vsyncpa [#allocation4 + $0x1], 0  ;;  %s2681_s24 = smov 0   ;;  %s2683_s25 = smov 0  }
  0x14   :  { %s2685_s26 = smov 0   ;;  %s2687_s27 = smov 0  }
  0x15 LB: > { %3392 = sst [smem:[#allocation40_spill]] %s2544_s24  ;;  %s2558_s28 = smov [#allocation5]   ;;  %s2556_s27 = sphi %s2687_s27, %s3459_s27   ;;  %s2552_s26 = sphi %s2685_s26, %s3458_s26   ;;  %s2548_s25 = sphi %s2683_s25, %s3457_s25   ;;  %s2544_s24 = sphi %s2681_s24, %s3456_s24  }
  0x16   : > { %3393 = sst [smem:[#allocation41_spill]] %s2548_s25  ;;  %s447_s29 = sshll.u32 %s2558_s28, 4  ;;  %s2707_s29 = int_to_ptr.vmem [resolvable:$true] %s447_s29 }
  0x17   : > { %3394 = sst [smem:[#allocation42_spill]] %s2552_s26  ;;  %s2702_s0 = sadd.s32 4294967295, %s2556_s27  }
  0x18   : > { %3395 = sst [smem:[#allocation43_spill]] %s2556_s27  ;;  %p1613_p0 = scmp.ge.s32.totalorder %s2556_s27, 1 }
  0x19   : > { %3396 = sst [smem:[#allocation44_spill]] %s2702_s0  ;;  %p3381_p1 = scmp.eq.s32.totalorder %s2702_s0, 0 }
  0x1a   : > { %p434_p2 = scmp.lt.s32.totalorder %s2556_s27, 3  ;;  %s2559_s18 = smov [#allocation8]  }
  0x1b   : > { %s469_s19 = sshll.u32 %s2559_s18, 4  ;;  %s2560_s1 = smov [#allocation11]   ;;  %s2716_s19 = int_to_ptr.vmem [resolvable:$true] %s469_s19 }
  0x1c   : > { %p2709_p3 = pnand %p1613_p0, %p434_p2  ;;  %s491_s20 = sshll.u32 %s2560_s1, 4  ;;  %s2724_s20 = int_to_ptr.vmem [resolvable:$true] %s491_s20 }
  0x1d   : > { %s2561_s22 = smov [#allocation14]  }
  0x1e   : > { %s3397_s30 = scalar_select %p2709_p3, 1, 0 }
  0x1f   : > { %p1789_p5 = pneg %p2709_p3  ;;  %s2726_s23 = sshll.u32 %s2561_s22, 4  ;;  %s514_s23 = int_to_ptr.vmem [resolvable:$true] %s2726_s23 }
  0x20   : > { %3398 = sst [smem:[#allocation45_spill]] %s3397_s30  ;;  %s3400_s30 = sld [smem:[#allocation47_spill]] }
  0x21   : > { %p2720_p6 = pnand %p1789_p5, %p3381_p1 }
  0x23   : > { %p2736_p8 = pneg %p2720_p6 }
  0x26   : > { %s1980_s24 = scalar_lea.hbm %s3400_s30, 64 }
  0x27   : > { %p1981_p7 = scmp.ne.s32.totalorder %s3400_s30, %s1980_s24  ;;  %p1987_p11 = scmp.lt.u32.totalorder %s1980_s24, %s3400_s30 }
  0x29   : > { %p1983_p9 = pnand %p2736_p8, %p1981_p7 }
  0x2b   : > { %p1984_p10 = pneg %p1983_p9 }
  0x2d   : > { %p1989_p12 = pnand %p1987_p11, %p1984_p10 }
  0x2f   : > { %1992 = shalt.err (!%p1989_p12)
}
  0x30   : > { %s1993_s17 = scalar_lea.vmem %s2707_s29, 64  ;;  %p2001_p5 = scmp.lt.s32.totalorder %s2707_s29, %s2707_s29 }
  0x31   : > { %p1994_p13 = scmp.ne.s32.totalorder %s2707_s29, %s1993_s17  ;;  %p2002_p4 = scmp.lt.s32.totalorder %s1993_s17, %s1993_s17 }
  0x33   : > { %p1996_p0 = pnand %p1994_p13, %p2736_p8  ;;  %p2003_p7 = por %p2002_p4, %p2001_p5 }
  0x35   : > { %p1997_p2 = pneg %p1996_p0 }
  0x37   : > { %p2004_p9 = pnand %p2003_p7, %p1997_p2 }
  0x39   : > { %2007 = shalt.err (!%p2004_p9)
}
  0x3a   : > { %1792 = dma.hbm_to_vmem [thread:$0]  (!%p2720_p6), %s3400_s30, 64, %s2707_s29, [#allocation6]  }
  0x3b   : > { %s3402_s3 = sld [smem:[#allocation49_spill]] }
  0x41   : > { %s2008_s18 = scalar_lea.hbm %s3402_s3, 128 }
  0x42   : > { %p2009_p10 = scmp.ne.s32.totalorder %s3402_s3, %s2008_s18  ;;  %p2015_p12 = scmp.lt.u32.totalorder %s2008_s18, %s3402_s3 }
  0x44   : > { %p2011_p4 = pnand %p2009_p10, %p2736_p8 }
  0x46   : > { %p2012_p11 = pneg %p2011_p4 }
  0x48   : > { %p2017_p13 = pnand %p2015_p12, %p2012_p11 }
  0x4a   : > { %2020 = shalt.err (!%p2017_p13)
}
  0x4b   : > { %s2021_s29 = scalar_lea.vmem %s2716_s19, 128  ;;  %p2029_p7 = scmp.lt.s32.totalorder %s2716_s19, %s2716_s19 }
  0x4c   : > { %p2022_p0 = scmp.ne.s32.totalorder %s2716_s19, %s2021_s29  ;;  %p2030_p9 = scmp.lt.s32.totalorder %s2021_s29, %s2021_s29 }
  0x4e   : > { %p2024_p2 = pnand %p2022_p0, %p2736_p8  ;;  %p2031_p10 = por %p2030_p9, %p2029_p7 }
  0x50   : > { %p2025_p5 = pneg %p2024_p2 }
  0x52   : > { %p2032_p4 = pnand %p2031_p10, %p2025_p5 }
  0x54   : > { %2035 = shalt.err (!%p2032_p4)
}
  0x55   : > { %1798 = dma.hbm_to_vmem [thread:$0]  (!%p2720_p6), %s3402_s3, 128, %s2716_s19, [#allocation9]  }
  0x56   : > { %s3403_s5 = sld [smem:[#allocation51_spill]] }
  0x5c   : > { %s2036_s0 = scalar_lea.hbm %s3403_s5, 128 }
  0x5d   : > { %p2037_p11 = scmp.ne.s32.totalorder %s3403_s5, %s2036_s0  ;;  %p2043_p0 = scmp.lt.u32.totalorder %s2036_s0, %s3403_s5 }
  0x5f   : > { %p2039_p12 = pnand %p2037_p11, %p2736_p8 }
  0x61   : > { %p2040_p13 = pneg %p2039_p12 }
  0x63   : > { %p2045_p2 = pnand %p2043_p0, %p2040_p13 }
  0x65   : > { %2048 = shalt.err (!%p2045_p2)
}
  0x66   : > { %s2049_s19 = scalar_lea.vmem %s2724_s20, 128  ;;  %p2057_p10 = scmp.lt.s32.totalorder %s2724_s20, %s2724_s20 }
  0x67   : > { %p2050_p5 = scmp.ne.s32.totalorder %s2724_s20, %s2049_s19  ;;  %p2058_p4 = scmp.lt.s32.totalorder %s2049_s19, %s2049_s19 }
  0x69   : > { %p2052_p7 = pnand %p2050_p5, %p2736_p8  ;;  %p2059_p11 = por %p2058_p4, %p2057_p10 }
  0x6b   : > { %p2053_p9 = pneg %p2052_p7 }
  0x6d   : > { %p2060_p12 = pnand %p2059_p11, %p2053_p9 }
  0x6f   : > { %2063 = shalt.err (!%p2060_p12)
}
  0x70   : > { %1804 = dma.hbm_to_vmem [thread:$0]  (!%p2720_p6), %s3403_s5, 128, %s2724_s20, [#allocation12]  }
  0x71   : > { %s2562_s27 = smov [#allocation17]   ;;  %s2064_s28 = scalar_lea.hbm %s3359_s7, 128 }
  0x72   : > { %s535_s24 = sshll.u32 %s2562_s27, 4  ;;  %p2065_p13 = scmp.ne.s32.totalorder %s3359_s7, %s2064_s28  ;;  %s536_s24 = int_to_ptr.vmem [resolvable:$true] %s535_s24 }
  0x73   : > { %p2071_p5 = scmp.lt.u32.totalorder %s2064_s28, %s3359_s7 }
  0x74   : > { %p2067_p0 = pnand %p2065_p13, %p2736_p8 }
  0x76   : > { %p2068_p2 = pneg %p2067_p0 }
  0x78   : > { %p2073_p7 = pnand %p2071_p5, %p2068_p2 }
  0x7a   : > { %2076 = shalt.err (!%p2073_p7)
}
  0x7b   : > { %s2077_s20 = scalar_lea.vmem %s514_s23, 128  ;;  %p2085_p11 = scmp.lt.s32.totalorder %s514_s23, %s514_s23 }
  0x7c   : > { %p2078_p9 = scmp.ne.s32.totalorder %s514_s23, %s2077_s20  ;;  %p2086_p12 = scmp.lt.s32.totalorder %s2077_s20, %s2077_s20 }
  0x7e   : > { %p2080_p10 = pnand %p2078_p9, %p2736_p8  ;;  %p2087_p1 = por %p2086_p12, %p2085_p11 }
  0x80   : > { %p2081_p4 = pneg %p2080_p10 }
  0x82   : > { %p2088_p3 = pnand %p2087_p1, %p2081_p4 }
  0x84   : > { %2091 = shalt.err (!%p2088_p3)
}
  0x85   : > { %1810 = dma.hbm_to_vmem [thread:$0]  (!%p2720_p6), %s3359_s7, 128, %s514_s23, [#allocation15]  }
  0x86   : > { %s2092_s0 = scalar_lea.hbm %s3361_s9, 128 }
  0x87   : > { %p2093_p13 = scmp.ne.s32.totalorder %s3361_s9, %s2092_s0  ;;  %p2099_p3 = scmp.lt.u32.totalorder %s2092_s0, %s3361_s9 }
  0x89   : > { %p2095_p0 = pnand %p2093_p13, %p2736_p8 }
  0x8b   : > { %p2096_p1 = pneg %p2095_p0 }
  0x8d   : > { %p2101_p2 = pnand %p2099_p3, %p2096_p1 }
  0x8f   : > { %2104 = shalt.err (!%p2101_p2)
}
  0x90   : > { %s2105_s19 = scalar_lea.vmem %s536_s24, 128  ;;  %p2113_p10 = scmp.lt.s32.totalorder %s536_s24, %s536_s24 }
  0x91   : > { %p2106_p5 = scmp.ne.s32.totalorder %s536_s24, %s2105_s19  ;;  %p2114_p4 = scmp.lt.s32.totalorder %s2105_s19, %s2105_s19 }
  0x93   : > { %p2108_p7 = pnand %p2106_p5, %p2736_p8  ;;  %p2115_p11 = por %p2114_p4, %p2113_p10 }
  0x95   : > { %p2109_p9 = pneg %p2108_p7 }
  0x97   : > { %p2116_p12 = pnand %p2115_p11, %p2109_p9 }
  0x99   : > { %2119 = shalt.err (!%p2116_p12)
}
  0x9a   : > { %1816 = dma.hbm_to_vmem [thread:$0]  (!%p2720_p6), %s3361_s9, 128, %s536_s24, [#allocation18]  }
  0x9b   : > { %s2563_s29 = smov [#allocation20]   ;;  %s2120_s0 = scalar_lea.hbm %s3363_s11, 256 }
  0x9c   : > { %s556_s26 = sshll.u32 %s2563_s29, 4  ;;  %p2121_p13 = scmp.ne.s32.totalorder %s3363_s11, %s2120_s0  ;;  %s557_s26 = int_to_ptr.vmem [resolvable:$true] %s556_s26 }
  0x9d   : > { %p2127_p3 = scmp.lt.u32.totalorder %s2120_s0, %s3363_s11 }
  0x9e   : > { %p2123_p0 = pnand %p2121_p13, %p2736_p8 }
  0xa0   : > { %p2124_p1 = pneg %p2123_p0 }
  0xa2   : > { %p2129_p2 = pnand %p2127_p3, %p2124_p1 }
  0xa4   : > { %2132 = shalt.err (!%p2129_p2)
}
  0xa5   : > { %s2133_s24 = scalar_lea.vmem %s557_s26, 256  ;;  %p2141_p10 = scmp.lt.s32.totalorder %s557_s26, %s557_s26 }
  0xa6   : > { %p2134_p5 = scmp.ne.s32.totalorder %s557_s26, %s2133_s24  ;;  %p2142_p4 = scmp.lt.s32.totalorder %s2133_s24, %s2133_s24 }
  0xa8   : > { %p2136_p7 = pnand %p2134_p5, %p2736_p8  ;;  %p2143_p11 = por %p2142_p4, %p2141_p10 }
  0xaa   : > { %p2137_p9 = pneg %p2136_p7 }
  0xac   : > { %p2144_p12 = pnand %p2143_p11, %p2137_p9 }
  0xae   : > { %2147 = shalt.err (!%p2144_p12)
}
  0xaf   : > { %s2564_s19 = smov 128   ;;  %s2565_s23 = smov 8  }
  0xb0   : > { %1822 = dma.hbm_to_vmem [thread:$0]  (!%p2720_p6), %s3363_s11, 256, %s557_s26, [#allocation21], %s2564_s19, %s2564_s19, %s2565_s23  }
  0xb1   : > { %s2566_s27 = smov [#allocation23]   ;;  %s2567_s0 = smov [#allocation26]  }
  0xb2   : > { %s583_s25 = sshll.u32 %s2566_s27, 4  ;;  %s604_s28 = sshll.u32 %s2567_s0, 4  ;;  %s584_s25 = int_to_ptr.vmem [resolvable:$true] %s583_s25  ;;  %s2861_s28 = int_to_ptr.vmem [resolvable:$true] %s604_s28 }
  0xb3   : > { %s2148_s17 = scalar_lea.hbm %s3365_s13, 64 }
  0xb4   : > { %p2149_p13 = scmp.ne.s32.totalorder %s3365_s13, %s2148_s17  ;;  %p2155_p3 = scmp.lt.u32.totalorder %s2148_s17, %s3365_s13 }
  0xb6   : > { %p2151_p0 = pnand %p2149_p13, %p2736_p8 }
  0xb8   : > { %p2152_p1 = pneg %p2151_p0 }
  0xba   : > { %p2157_p2 = pnand %p2155_p3, %p2152_p1 }
  0xbc   : > { %2160 = shalt.err (!%p2157_p2)
}
  0xbd   : > { %s2161_s29 = scalar_lea.vmem %s584_s25, 64  ;;  %p2169_p10 = scmp.lt.s32.totalorder %s584_s25, %s584_s25 }
  0xbe   : > { %p2162_p5 = scmp.ne.s32.totalorder %s584_s25, %s2161_s29  ;;  %p2170_p4 = scmp.lt.s32.totalorder %s2161_s29, %s2161_s29 }
  0xc0   : > { %p2164_p7 = pnand %p2162_p5, %p2736_p8  ;;  %p2171_p11 = por %p2170_p4, %p2169_p10 }
  0xc2   : > { %p2165_p9 = pneg %p2164_p7 }
  0xc4   : > { %p2172_p12 = pnand %p2171_p11, %p2165_p9 }
  0xc6   : > { %2175 = shalt.err (!%p2172_p12)
}
  0xc7   : > { %1828 = dma.hbm_to_vmem [thread:$0]  (!%p2720_p6), %s3365_s13, 64, %s584_s25, [#allocation24]  }
  0xc8   : > { %s2176_s22 = scalar_lea.hbm %s3367_s15, 256 }
  0xc9   : > { %p2177_p13 = scmp.ne.s32.totalorder %s3367_s15, %s2176_s22  ;;  %p2183_p3 = scmp.lt.u32.totalorder %s2176_s22, %s3367_s15 }
  0xcb   : > { %p2179_p0 = pnand %p2177_p13, %p2736_p8 }
  0xcd   : > { %p2180_p1 = pneg %p2179_p0 }
  0xcf   : > { %p2185_p2 = pnand %p2183_p3, %p2180_p1 }
  0xd1   : > { %2188 = shalt.err (!%p2185_p2)
}
  0xd2   : > { %s2189_s25 = scalar_lea.vmem %s2861_s28, 256  ;;  %p2197_p10 = scmp.lt.s32.totalorder %s2861_s28, %s2861_s28 }
  0xd3   : > { %p2190_p5 = scmp.ne.s32.totalorder %s2861_s28, %s2189_s25  ;;  %p2198_p4 = scmp.lt.s32.totalorder %s2189_s25, %s2189_s25 }
  0xd5   : > { %p2192_p7 = pnand %p2190_p5, %p2736_p8  ;;  %p2199_p11 = por %p2198_p4, %p2197_p10 }
  0xd7   : > { %p2193_p9 = pneg %p2192_p7 }
  0xd9   : > { %p2200_p12 = pnand %p2199_p11, %p2193_p9 }
  0xdb   : > { %2203 = shalt.err (!%p2200_p12)
}
  0xdc   : > { %1834 = dma.hbm_to_vmem [thread:$0]  (!%p2720_p6), %s3367_s15, 256, %s2861_s28, [#allocation27], %s2564_s19, %s2564_s19, %s2565_s23  }
  0xdd   : > { %s2568_s27 = smov [#allocation7]   ;;  %s2569_s18 = smov [#allocation10]  }
  0xde   : > { %s458_s0 = sshll.u32 %s2568_s27, 4  ;;  %s480_s22 = sshll.u32 %s2569_s18, 4  ;;  %s459_s0 = int_to_ptr.vmem [resolvable:$true] %s458_s0  ;;  %s2907_s22 = int_to_ptr.vmem [resolvable:$true] %s480_s22 }
  0xdf   : > { %s3404_s2 = sld [smem:[#allocation48_spill]] }
  0xe5   : > { %s2204_s20 = scalar_lea.hbm %s3404_s2, 64 }
  0xe6   : > { %p2205_p13 = scmp.ne.s32.totalorder %s3404_s2, %s2204_s20  ;;  %p2211_p3 = scmp.lt.u32.totalorder %s2204_s20, %s3404_s2 }
  0xe8   : > { %p2207_p0 = pnand %p2205_p13, %p2736_p8 }
  0xea   : > { %p2208_p1 = pneg %p2207_p0 }
  0xec   : > { %p2213_p2 = pnand %p2211_p3, %p2208_p1 }
  0xee   : > { %2216 = shalt.err (!%p2213_p2)
}
  0xef   : > { %s2217_s3 = scalar_lea.vmem %s459_s0, 64  ;;  %p2225_p10 = scmp.lt.s32.totalorder %s459_s0, %s459_s0 }
  0xf0   : > { %p2218_p5 = scmp.ne.s32.totalorder %s459_s0, %s2217_s3  ;;  %p2226_p4 = scmp.lt.s32.totalorder %s2217_s3, %s2217_s3 }
  0xf2   : > { %p2220_p7 = pnand %p2218_p5, %p2736_p8  ;;  %p2227_p11 = por %p2226_p4, %p2225_p10 }
  0xf4   : > { %p2221_p9 = pneg %p2220_p7 }
  0xf6   : > { %p2228_p12 = pnand %p2227_p11, %p2221_p9 }
  0xf8   : > { %2231 = shalt.err (!%p2228_p12)
}
  0xf9   : > { %1795 = dma.hbm_to_vmem [thread:$0]  (!%p2720_p6), %s3404_s2, 64, %s459_s0, [#allocation6]  }
  0xfa   : > { %s3405_s4 = sld [smem:[#allocation50_spill]] }
 0x100   : > { %s2232_s20 = scalar_lea.hbm %s3405_s4, 128 }
 0x101   : > { %p2233_p13 = scmp.ne.s32.totalorder %s3405_s4, %s2232_s20  ;;  %p2239_p3 = scmp.lt.u32.totalorder %s2232_s20, %s3405_s4 }
 0x103   : > { %p2235_p0 = pnand %p2233_p13, %p2736_p8 }
 0x105   : > { %p2236_p1 = pneg %p2235_p0 }
 0x107   : > { %p2241_p2 = pnand %p2239_p3, %p2236_p1 }
 0x109   : > { %2244 = shalt.err (!%p2241_p2)
}
 0x10a   : > { %s2245_s0 = scalar_lea.vmem %s2907_s22, 128  ;;  %p2253_p10 = scmp.lt.s32.totalorder %s2907_s22, %s2907_s22 }
 0x10b   : > { %p2246_p5 = scmp.ne.s32.totalorder %s2907_s22, %s2245_s0  ;;  %p2254_p4 = scmp.lt.s32.totalorder %s2245_s0, %s2245_s0 }
 0x10d   : > { %p2248_p7 = pnand %p2246_p5, %p2736_p8  ;;  %p2255_p11 = por %p2254_p4, %p2253_p10 }
 0x10f   : > { %p2249_p9 = pneg %p2248_p7 }
 0x111   : > { %p2256_p12 = pnand %p2255_p11, %p2249_p9 }
 0x113   : > { %2259 = shalt.err (!%p2256_p12)
}
 0x114   : > { %1801 = dma.hbm_to_vmem [thread:$0]  (!%p2720_p6), %s3405_s4, 128, %s2907_s22, [#allocation9]  }
 0x115   : > { %s2570_s18 = smov [#allocation13]   ;;  %s2571_s24 = smov [#allocation16]  }
 0x116   : > { %s502_s17 = sshll.u32 %s2570_s18, 4  ;;  %s524_s20 = sshll.u32 %s2571_s24, 4  ;;  %s503_s17 = int_to_ptr.vmem [resolvable:$true] %s502_s17  ;;  %s2950_s20 = int_to_ptr.vmem [resolvable:$true] %s524_s20 }
 0x117   : > { %s2260_s29 = scalar_lea.hbm %s3358_s6, 128 }
 0x118   : > { %p2261_p13 = scmp.ne.s32.totalorder %s3358_s6, %s2260_s29  ;;  %p2267_p3 = scmp.lt.u32.totalorder %s2260_s29, %s3358_s6 }
 0x11a   : > { %p2263_p0 = pnand %p2261_p13, %p2736_p8 }
 0x11c   : > { %p2264_p1 = pneg %p2263_p0 }
 0x11e   : > { %p2269_p2 = pnand %p2267_p3, %p2264_p1 }
 0x120   : > { %2272 = shalt.err (!%p2269_p2)
}
 0x121   : > { %s2273_s27 = scalar_lea.vmem %s503_s17, 128  ;;  %p2281_p10 = scmp.lt.s32.totalorder %s503_s17, %s503_s17 }
 0x122   : > { %p2274_p5 = scmp.ne.s32.totalorder %s503_s17, %s2273_s27  ;;  %p2282_p4 = scmp.lt.s32.totalorder %s2273_s27, %s2273_s27 }
 0x124   : > { %p2276_p7 = pnand %p2274_p5, %p2736_p8  ;;  %p2283_p11 = por %p2282_p4, %p2281_p10 }
 0x126   : > { %p2277_p9 = pneg %p2276_p7 }
 0x128   : > { %p2284_p12 = pnand %p2283_p11, %p2277_p9 }
 0x12a   : > { %2287 = shalt.err (!%p2284_p12)
}
 0x12b   : > { %1807 = dma.hbm_to_vmem [thread:$0]  (!%p2720_p6), %s3358_s6, 128, %s503_s17, [#allocation12]  }
 0x12c   : > { %s2288_s29 = scalar_lea.hbm %s3360_s8, 128 }
 0x12d   : > { %p2289_p13 = scmp.ne.s32.totalorder %s3360_s8, %s2288_s29  ;;  %p2295_p3 = scmp.lt.u32.totalorder %s2288_s29, %s3360_s8 }
 0x12f   : > { %p2291_p0 = pnand %p2289_p13, %p2736_p8 }
 0x131   : > { %p2292_p1 = pneg %p2291_p0 }
 0x133   : > { %p2297_p2 = pnand %p2295_p3, %p2292_p1 }
 0x135   : > { %2300 = shalt.err (!%p2297_p2)
}
 0x136   : > { %s2301_s17 = scalar_lea.vmem %s2950_s20, 128  ;;  %p2309_p10 = scmp.lt.s32.totalorder %s2950_s20, %s2950_s20 }
 0x137   : > { %p2302_p5 = scmp.ne.s32.totalorder %s2950_s20, %s2301_s17  ;;  %p2310_p4 = scmp.lt.s32.totalorder %s2301_s17, %s2301_s17 }
 0x139   : > { %p2304_p7 = pnand %p2302_p5, %p2736_p8  ;;  %p2311_p11 = por %p2310_p4, %p2309_p10 }
 0x13b   : > { %p2305_p9 = pneg %p2304_p7 }
 0x13d   : > { %p2312_p12 = pnand %p2311_p11, %p2305_p9 }
 0x13f   : > { %2315 = shalt.err (!%p2312_p12)
}
 0x140   : > { %1813 = dma.hbm_to_vmem [thread:$0]  (!%p2720_p6), %s3360_s8, 128, %s2950_s20, [#allocation15]  }
 0x141   : > { %s2572_s24 = smov [#allocation19]   ;;  %s2573_s25 = smov [#allocation22]  }
 0x142   : > { %s546_s26 = sshll.u32 %s2572_s24, 4  ;;  %s569_s29 = sshll.u32 %s2573_s25, 4  ;;  %s547_s26 = int_to_ptr.vmem [resolvable:$true] %s546_s26  ;;  %s2993_s29 = int_to_ptr.vmem [resolvable:$true] %s569_s29 }
 0x143   : > { %s2316_s3 = scalar_lea.hbm %s3362_s10, 128 }
 0x144   : > { %p2317_p13 = scmp.ne.s32.totalorder %s3362_s10, %s2316_s3  ;;  %p2323_p3 = scmp.lt.u32.totalorder %s2316_s3, %s3362_s10 }
 0x146   : > { %p2319_p0 = pnand %p2317_p13, %p2736_p8 }
 0x148   : > { %p2320_p1 = pneg %p2319_p0 }
 0x14a   : > { %p2325_p2 = pnand %p2323_p3, %p2320_p1 }
 0x14c   : > { %2328 = shalt.err (!%p2325_p2)
}
 0x14d   : > { %s2329_s18 = scalar_lea.vmem %s547_s26, 128  ;;  %p2337_p10 = scmp.lt.s32.totalorder %s547_s26, %s547_s26 }
 0x14e   : > { %p2330_p5 = scmp.ne.s32.totalorder %s547_s26, %s2329_s18  ;;  %p2338_p4 = scmp.lt.s32.totalorder %s2329_s18, %s2329_s18 }
 0x150   : > { %p2332_p7 = pnand %p2330_p5, %p2736_p8  ;;  %p2339_p11 = por %p2338_p4, %p2337_p10 }
 0x152   : > { %p2333_p9 = pneg %p2332_p7 }
 0x154   : > { %p2340_p12 = pnand %p2339_p11, %p2333_p9 }
 0x156   : > { %2343 = shalt.err (!%p2340_p12)
}
 0x157   : > { %1819 = dma.hbm_to_vmem [thread:$0]  (!%p2720_p6), %s3362_s10, 128, %s547_s26, [#allocation18]  }
 0x158   : > { %s2344_s3 = scalar_lea.hbm %s3364_s12, 256 }
 0x159   : > { %p2345_p13 = scmp.ne.s32.totalorder %s3364_s12, %s2344_s3  ;;  %p2351_p3 = scmp.lt.u32.totalorder %s2344_s3, %s3364_s12 }
 0x15b   : > { %p2347_p0 = pnand %p2345_p13, %p2736_p8 }
 0x15d   : > { %p2348_p1 = pneg %p2347_p0 }
 0x15f   : > { %p2353_p2 = pnand %p2351_p3, %p2348_p1 }
 0x161   : > { %2356 = shalt.err (!%p2353_p2)
}
 0x162   : > { %s2357_s26 = scalar_lea.vmem %s2993_s29, 256  ;;  %p2365_p10 = scmp.lt.s32.totalorder %s2993_s29, %s2993_s29 }
 0x163   : > { %p2358_p5 = scmp.ne.s32.totalorder %s2993_s29, %s2357_s26  ;;  %p2366_p4 = scmp.lt.s32.totalorder %s2357_s26, %s2357_s26 }
 0x165   : > { %p2360_p7 = pnand %p2358_p5, %p2736_p8  ;;  %p2367_p11 = por %p2366_p4, %p2365_p10 }
 0x167   : > { %p2361_p9 = pneg %p2360_p7 }
 0x169   : > { %p2368_p12 = pnand %p2367_p11, %p2361_p9 }
 0x16b   : > { %2371 = shalt.err (!%p2368_p12)
}
 0x16c   : > { %1825 = dma.hbm_to_vmem [thread:$0]  (!%p2720_p6), %s3364_s12, 256, %s2993_s29, [#allocation21], %s2564_s19, %s2564_s19, %s2565_s23  }
 0x16d   : > { %s2574_s25 = smov [#allocation25]   ;;  %s2575_s0 = smov [#allocation28]  }
 0x16e   : > { %s594_s28 = sshll.u32 %s2574_s25, 4  ;;  %s617_s3 = sshll.u32 %s2575_s0, 4  ;;  %s595_s28 = int_to_ptr.vmem [resolvable:$true] %s594_s28  ;;  %s3039_s3 = int_to_ptr.vmem [resolvable:$true] %s617_s3 }
 0x16f   : > { %s2372_s27 = scalar_lea.hbm %s3366_s14, 64 }
 0x170   : > { %p2373_p13 = scmp.ne.s32.totalorder %s3366_s14, %s2372_s27  ;;  %p2379_p3 = scmp.lt.u32.totalorder %s2372_s27, %s3366_s14 }
 0x172   : > { %p2375_p0 = pnand %p2373_p13, %p2736_p8 }
 0x174   : > { %p2376_p1 = pneg %p2375_p0 }
 0x176   : > { %p2381_p2 = pnand %p2379_p3, %p2376_p1 }
 0x178   : > { %2384 = shalt.err (!%p2381_p2)
}
 0x179   : > { %s2385_s24 = scalar_lea.vmem %s595_s28, 64  ;;  %p2393_p10 = scmp.lt.s32.totalorder %s595_s28, %s595_s28 }
 0x17a   : > { %p2386_p5 = scmp.ne.s32.totalorder %s595_s28, %s2385_s24  ;;  %p2394_p4 = scmp.lt.s32.totalorder %s2385_s24, %s2385_s24 }
 0x17c   : > { %p2388_p7 = pnand %p2386_p5, %p2736_p8  ;;  %p2395_p11 = por %p2394_p4, %p2393_p10 }
 0x17e   : > { %p2389_p9 = pneg %p2388_p7 }
 0x180   : > { %p2396_p12 = pnand %p2395_p11, %p2389_p9 }
 0x182   : > { %2399 = shalt.err (!%p2396_p12)
}
 0x183   : > { %1831 = dma.hbm_to_vmem [thread:$0]  (!%p2720_p6), %s3366_s14, 64, %s595_s28, [#allocation24]  }
 0x184   : > { %s2400_s27 = scalar_lea.hbm %s3368_s16, 256 }
 0x185   : > { %p2401_p13 = scmp.ne.s32.totalorder %s3368_s16, %s2400_s27  ;;  %p2407_p3 = scmp.lt.u32.totalorder %s2400_s27, %s3368_s16 }
 0x187   : > { %p2403_p0 = pnand %p2401_p13, %p2736_p8 }
 0x189   : > { %p2404_p1 = pneg %p2403_p0 }
 0x18b   : > { %p2409_p2 = pnand %p2407_p3, %p2404_p1 }
 0x18d   : > { %2412 = shalt.err (!%p2409_p2)
}
 0x18e   : > { %s2413_s28 = scalar_lea.vmem %s3039_s3, 256  ;;  %p2421_p10 = scmp.lt.s32.totalorder %s3039_s3, %s3039_s3 }
 0x18f   : > { %p2414_p5 = scmp.ne.s32.totalorder %s3039_s3, %s2413_s28  ;;  %p2422_p4 = scmp.lt.s32.totalorder %s2413_s28, %s2413_s28 }
 0x191   : > { %p2416_p7 = pnand %p2414_p5, %p2736_p8  ;;  %p2423_p11 = por %p2422_p4, %p2421_p10 }
 0x193   : > { %p2417_p9 = pneg %p2416_p7 }
 0x195   : > { %p2424_p12 = pnand %p2423_p11, %p2417_p9 }
 0x197   : > { %2427 = shalt.err (!%p2424_p12)
}
 0x198   : > { %s3406_s0 = sld [smem:[#allocation43_spill]]  ;;  %s3407_s1 = sld [smem:[#allocation42_spill]] }
 0x199   : > { %s3408_s22 = sld [smem:[#allocation41_spill]]  ;;  %s3409_s17 = sld [smem:[#allocation40_spill]] }
 0x19a   : > { %s3410_s27 = sld [smem:[#allocation44_spill]] }
 0x19b   : > { %1837 = dma.hbm_to_vmem [thread:$0]  (!%p2720_p6), %s3368_s16, 256, %s3039_s3, [#allocation27], %s2564_s19, %s2564_s19, %s2565_s23  }
 0x19e   : > { %s1612_s21 = sadd.s32 4294967294, %s3406_s0   ;;  %s3087_s20 = sadd.s32 1, %s3406_s0  }
 0x19f   : > { %s45_s26 = ssub.s32 %s3406_s0, %s3087_s20  ;;  %s48_s18 = sadd.s32 1, %s3407_s1 }
 0x1a0   : > { %p46_p8 = scmp.eq.s32.totalorder %s45_s26, 0  ;;  %p55_p13 = scmp.ne.s32.totalorder %s3407_s1, %s3408_s22 }
 0x1a1   : > { %p56_p0 = scmp.eq.s32.totalorder %s3406_s0, 0  ;;  %p61_p1 = scmp.ne.s32.totalorder %s3408_s22, %s3409_s17 }
 0x1a2   : > { %s3098_s29 = scalar_select %p46_p8, %s3407_s1, %s48_s18  }
 0x1a3   : > { %p3100_p3 = por %p56_p0, %p55_p13  ;;  %p3412_p2 = scmp.eq.s32.totalorder %s3410_s27, 0 }
 0x1a4   : > { %p421_p5 = scmp.eq.s32.totalorder %s3410_s27, 1  ;;  %p427_p7 = scmp.eq.s32.totalorder %s1612_s21, 1 }
 0x1a5   : > { %p3106_p6 = por %p3412_p2, %p61_p1  ;;  %p1862_p9 = scmp.lt.s32.totalorder %s3406_s0, 2 }
 0x1a6   : > { %s631_s23 = sand.u32 1, %s3407_s1   ;;  %p3113_p10 = por %p421_p5, %p55_p13 }
 0x1a7   : > { %p3117_p4 = por %p427_p7, %p61_p1  ;;  %s1631_s25 = sshll.u32 %s631_s23, 3 }
 0x1a8   : > { %s3414_s3 = scalar_select %p3113_p10, 1, 0 }
 0x1a9   : > { %s3415_s24 = scalar_select %p3117_p4, 1, 0 }
 0x1aa   : > { %s1683_s22 = sshll.u32 %s3406_s0, 7  ;;  %s3416_s18 = sld [smem:[#allocation46_spill]] }
 0x1ab   : > { %s635_s1 = scalar_lea.vmem [#allocation2], %s1631_s25  ;;  %p3131_p11 = pnand %p1862_p9, %p3100_p3 }
 0x1ac   : > { %s643_s27 = sshll.u32 %s635_s1, 4  ;;  %s632_s0 = scalar_lea.sflag [#allocation3], %s631_s23  ;;  %s3127_s27 = int_to_ptr.vmem [resolvable:$true] %s643_s27 }
 0x1ad   : > { %p2430_p8 = pneg %p3131_p11 }
 0x1b0   : > { %s3125_s2 = scalar_lea.hbm %s3416_s18, %s1683_s22  ;;  %s2433_s17 = scalar_lea.hbm %s3416_s18, 256 }
 0x1b1   : > { %s2428_s4 = scalar_lea.hbm %s3125_s2, 128  ;;  %p2434_p1 = scmp.lt.u32.totalorder %s3125_s2, %s3416_s18 }
 0x1b2   : > { %p2429_p12 = scmp.ne.s32.totalorder %s3125_s2, %s2428_s4  ;;  %p2435_p3 = scmp.lt.u32.totalorder %s2433_s17, %s2428_s4 }
 0x1b3   : > { %p2437_p5 = scmp.lt.u32.totalorder %s2428_s4, %s3125_s2 }
 0x1b4   : > { %p2431_p13 = pnand %p2430_p8, %p2429_p12  ;;  %p2436_p2 = por %p2435_p3, %p2434_p1 }
 0x1b6   : > { %p2432_p0 = pneg %p2431_p13  ;;  %p2438_p7 = por %p2437_p5, %p2436_p2 }
 0x1b8   : > { %p2439_p9 = pnand %p2438_p7, %p2432_p0 }
 0x1ba   : > { %2442 = shalt.err (!%p2439_p9)
}
 0x1bb   : > { %s2443_s23 = scalar_lea.vmem %s3127_s27, 128  ;;  %s2576_s1 = smov [#allocation2]  }
 0x1bc   : > { %p2444_p12 = scmp.ne.s32.totalorder %s3127_s27, %s2443_s23  ;;  %s2448_s25 = sshll.u32 %s2576_s1, 4  ;;  %s2449_s25 = int_to_ptr.vmem [resolvable:$false] %s2448_s25 }
 0x1bd   : > { %s2450_s22 = scalar_lea.vmem %s2449_s25, 256  ;;  %p2451_p10 = scmp.lt.s32.totalorder %s3127_s27, %s2449_s25 }
 0x1be   : > { %p2446_p13 = pnand %p2444_p12, %p2430_p8  ;;  %p2452_p1 = scmp.lt.s32.totalorder %s2450_s22, %s2443_s23 }
 0x1c0   : > { %p2447_p4 = pneg %p2446_p13  ;;  %p2453_p3 = por %p2452_p1, %p2451_p10 }
 0x1c2   : > { %p2454_p2 = pnand %p2453_p3, %p2447_p4 }
 0x1c4   : > { %2457 = shalt.err (!%p2454_p2)
}
 0x1c5   : > { %1841 = dma.hbm_to_vmem [thread:$0]  (!%p3131_p11), %s3125_s2, 128, %s3127_s27, %s632_s0  }
 0x1c6   : > { %s3418_s4 = sld [smem:[#allocation45_spill]] }
 0x1cc   : > { %p3419_p0 = scmp.ne.s32.totalorder %s3418_s4, 0 }
 0x1cd   : > { %s3420_s17 = sld [smem:[#allocation41_spill]] (!%p3419_p0) }
 0x1ce   : > { %652 = sbr.rel (%p3419_p0) target bundleno = 1473 (0x5c1), region = 88 }
 0x1d3   : > { %s3163_s28 = sand.u32 (!%p3419_p0), 1, %s3420_s17  }
 0x1d4   : > { %s1635_s26 = sshll.u32 (!%p3419_p0), %s3163_s28, 3  ;;  %s655_s1 = scalar_lea.sflag (!%p3419_p0), [#allocation3], %s3163_s28 }
 0x1d5   : > { %s3167_s23 = scalar_lea.vmem [#allocation2], %s1635_s26 }
 0x1d6   : > { %2503 = dma.done.wait (%p3106_p6), %s655_s1, 128  }
 0x1d7   : > { %2505 = vsyncadd (%p3106_p6), %s655_s1, 4294967168  ;;  %s3421_s21 = sld [smem:[#allocation44_spill]] }
 0x1dd   : > { %p3422_p10 = scmp.eq.s32.totalorder %s3421_s21, 0 }
 0x1df   : > { %2507 = dma.done.wait (%p3422_p10), [#allocation6], 128   ;;  %p3423_p4 = pmov %p3422_p10 }
 0x1e1   : > { %2509 = vsyncadd (%p3423_p4), [#allocation6], 4294967168  ;;  %p3424_p11 = pmov %p3423_p4 }
 0x1e2   : > { %p3425_p8 = pmov %p3423_p4 }
 0x1e3   : > { %2511 = dma.done.wait (%p3424_p11), [#allocation9], 256  }
 0x1e4   : > { %2513 = vsyncadd (%p3425_p8), [#allocation9], 4294967040  ;;  %p3426_p5 = pmov %p3423_p4 }
 0x1e5   : > { %p3427_p7 = pmov %p3423_p4 }
 0x1e6   : > { %2515 = dma.done.wait (%p3426_p5), [#allocation12], 256  }
 0x1e7   : > { %2517 = vsyncadd (%p3427_p7), [#allocation12], 4294967040  ;;  %p3428_p6 = pmov %p3423_p4 }
 0x1e8   : > { %p3429_p9 = pmov %p3423_p4 }
 0x1e9   : > { %2519 = dma.done.wait (%p3428_p6), [#allocation15], 256  }
 0x1ea   : > { %2521 = vsyncadd (%p3429_p9), [#allocation15], 4294967040  ;;  %p3430_p12 = pmov %p3423_p4 }
 0x1eb   : > { %p3431_p13 = pmov %p3423_p4 }
 0x1ec   : > { %2523 = dma.done.wait (%p3430_p12), [#allocation18], 256  }
 0x1ed   : > { %2525 = vsyncadd (%p3431_p13), [#allocation18], 4294967040  ;;  %p3432_p1 = pmov %p3423_p4 }
 0x1ef   : > { %2527 = dma.done.wait (%p3432_p1), [#allocation21], 512   ;;  %p3433_p3 = pmov %p3432_p1 }
 0x1f0   : > { %p3434_p2 = pmov %p3432_p1 }
 0x1f1   : > { %2529 = vsyncadd (%p3433_p3), [#allocation21], 4294966784 }
 0x1f2   : > { %2531 = dma.done.wait (%p3434_p2), [#allocation24], 128   ;;  %p3435_p0 = pmov %p3432_p1 }
 0x1f4   : > { %2533 = vsyncadd (%p3435_p0), [#allocation24], 4294967168  ;;  %p3436_p10 = pmov %p3435_p0 }
 0x1f5   : > { %p3437_p4 = pmov %p3435_p0 }
 0x1f6   : > { %2535 = dma.done.wait (%p3436_p10), [#allocation27], 512  }
 0x1f7   : > { %2537 = vsyncadd (%p3437_p4), [#allocation27], 4294966784  ;;  %v2577_v0 = vmov 0   ;;  %v774_v1 = vld [vmem:[#allocation5] sm:$0xf]  ;;  %v2578_v4 = vmov 0.0   ;;  %v782_v9 = vlaneseq }
 0x1f8   : > { %1943 = vset.pattern.permute.xlu0 %v2577_v0  ;;  %1944 = vset.pattern.permute.xlu1 %v2577_v0  ;;  %v788_v2 = vld [vmem:[#allocation7] sm:$0xf]  ;;  %v804_v5 = vld [vmem:[#allocation10] sm:$0xff]  ;;  %v892_v6 = vld [vmem:[#allocation11] sm:$0xff]  ;;  %v2579_v7 = vmov 839922192  }
 0x1f9   : > { %777 = vperm.xlu0 %1943, %v774_v1   ;;  %v900_v3 = vld [vmem:[#allocation13] sm:$0xff]  ;;  %885 = vmatprep.mubr.f32.mxu0 %v2578_v4  ;;  %v780_v8 = vunpack.c.l.s4 %v2579_v7  ;;  %v783_v11 = vshrl.u32 %v782_v9, 7  ;;  %v3212_v15 = vld [vmem:[%s3167_s23] sm:$0xff]  ;;  %vm816_vm0 = vcmask 1043456   ;;  %v803_v22 = vld [vmem:[#allocation8] sm:$0xff]  ;;  %vm812_vm1 = vcmask 31744  }
 0x1fa   : > { %1110 = vmatprep.mubr.f32.mxu1 %v2578_v4  ;;  %807 = vperm.xlu1 %1944, %v804_v5   ;;  %s3384_s2 = smov 16   ;;  %s2581_s19 = smov 17   ;;  %v1036_v38 = vld [vmem:[#allocation16] sm:$0xff]  ;;  %v1125_v39 = vld [vmem:[#allocation19] sm:$0xff]  ;;  %v1117_v40 = vld [vmem:[#allocation17] sm:$0xff]  ;;  %v911_v47 = vand.u32 127, %v782_v9 }
 0x1fb   : > { %v781_v10 = vunpack.c.0.s8 %v780_v8  ;;  %s2582_s27 = smov 1   ;;  %s2583_s0 = smov 15   ;;  %v1247_v41 = vld [vmem:[#allocation25] sm:$0xf]  ;;  %v1233_v42 = vld [vmem:[#allocation23] sm:$0xf] }
 0x1fc   : > { %s2584_s25 = smov 113   ;;  %s2585_s22 = smov 127   ;;  %v1138_v43 = vld [vmem:[#allocation22 + $0x8] sm:$0xff]  ;;  %v1137_v44 = vld [vmem:[#allocation22] sm:$0xff]  ;;  %v1265_v45 = vld [vmem:[#allocation28 + $0x8] sm:$0xff]  ;;  %v912_v48 = vadd.s32 128, %v911_v47 }
 0x1fd   : > { %791 = vperm.xlu0 %1943, %v788_v2   ;;  %v3208_v12 = vsub.s32 %v781_v10, %v783_v11  ;;  %s2586_s4 = smov 111   ;;  %s2587_s17 = smov 112   ;;  %v1264_v46 = vld [vmem:[#allocation28] sm:$0xff]  ;;  %v917_v50 = vand.u32 15, %v911_v47  ;;  %vm947_vm2 = vcmask 138240   ;;  %vm962_vm4 = vcmask 130048  }
 0x1fe   : > { %895 = vperm.xlu1 %1944, %v892_v6   ;;  %v924_v49 = vand.u32 15, %v912_v48  ;;  %vm3240_vm6 = vmneg %vm962_vm4  ;;  %vm986_vm7 = vcmask 7168   ;;  %vm971_vm8 = vcmask 121856   ;;  %vm2588_vm9 = vmmov 1   ;;  %s1652_s26 = sshll.u32 %s3163_s28, 5  ;;  %p3450_p8 = scmp.ne.s32.totalorder %s3414_s3, 0 }
 0x1ff   : > { %vm3236_vm5 = vcmp.ge.s32.totalorder %v917_v50, 1  ;;  %vm3255_vm13 = vcmp.le.s32.totalorder %v917_v50, 14  ;;  %vm997_vm15 = vcmask 1039360   ;;  %s772_s1 = scalar_lea.vmem [#allocation29], %s1652_s26 }
 0x200   : > { %vm3232_vm3 = vcmp.ge.s32.totalorder %v924_v49, 1  ;;  %vm1689_vm11 = vmpackc.low %vm3240_vm6, %vm3236_vm5  ;;  %vm3251_vm12 = vcmp.le.s32.totalorder %v924_v49, 14  ;;  %s1387_s23 = sshll.u32 %s772_s1, 4  ;;  %s3302_s23 = int_to_ptr.vmem [resolvable:$true] %s1387_s23 }
 0x201   : > { %903 = vperm.xlu0 %1943, %v900_v3   ;;  %vm1686_vm10 = vmpackc.low %vm2588_vm9, %vm3232_vm3  ;;  %s2458_s26 = scalar_lea.vmem %s3302_s23, 512 }
 0x202   : > { %vm1692_vm14 = vmpackc.low %vm3232_vm3, %vm3251_vm12  ;;  %p2459_p11 = scmp.ne.s32.totalorder %s3302_s23, %s2458_s26 }
 0x203   : > { %vm1698_vm6 = vmpackc.low %vm3251_vm12, %vm2588_vm9 }
 0x204   : > { %p2460_p5 = pnand %p2459_p11, %p3450_p8 }
 0x206   : > { %p2461_p7 = pneg %p2460_p5 }
 0x278   : > { %v778_v13 = vpop.permute.xlu0 %777 }
 0x279   : > { %v785_v14 = vrot.slane %v778_v13, %v3208_v12  ;;  %v808_v23 = vpop.permute.xlu1 %807 }
 0x27b   : > { %v787_v17 = vmul.f32 %v785_v14, %v3212_v15 }
 0x27c   : > { %v792_v16 = vpop.permute.xlu0 %791 }
 0x27d   : > { %v799_v18 = vrot.slane %v792_v16, %v3208_v12  ;;  %v896_v27 = vpop.permute.xlu1 %895 }
 0x27f   : > { %v801_v19 = vadd.f32 %v799_v18, %v787_v17 }
 0x280   : > { %v904_v30 = vpop.permute.xlu0 %903 }
 0x281   : > { %v802_v20 = vmax.f32 %v801_v19, 0.0 }
 0x283   : > { %v811_v21 = vcombine.high %v802_v20, %v802_v20 }
 0x285   : > { %1653 = vmatprep.subr.msk.mxu0 %vm816_vm0, %v811_v21 }
 0x286   : > { %1654 = vmatpush1.msk.msra.mxu0 %vm816_vm0, %v802_v20 }
 0x287   : > { %1655 = vmatmul.mubr.msk.f32.vlgmr.msra.gmra.mrb[0].mxu0 %vm812_vm1, %v803_v22 }
 0x288   : > { %1220 = vmatprep.mubr.f32.mxu0 %v2578_v4 }
 0x35a   : > { %v887_v24 = vpop.f32.mrb[0].mxu0 }
 0x35b   : > { %v888_v25 = vadd.f32 %v887_v24, %v808_v23  ;;  %v889_v26 = vpop.f32.mrb[1].mxu0 }
 0x35c   : > { %v890_v28 = vadd.f32 %v889_v26, %v808_v23 }
 0x35d   : > { %v898_v29 = vmul.f32 %v896_v27, %v888_v25 }
 0x35e   : > { %v899_v31 = vmul.f32 %v896_v27, %v890_v28 }
 0x35f   : > { %v906_v32 = vadd.f32 %v904_v30, %v898_v29 }
 0x360   : > { %v907_v33 = vadd.f32 %v904_v30, %v899_v31 }
 0x361   : > { %v3220_v34 = vmax.f32 %v906_v32, 0.0 }
 0x362   : > { %v3222_v35 = vmax.f32 %v907_v33, 0.0 }
 0x364   : > { %v1950_v36 = vpack.i.bf16 %v3222_v35, %v3220_v34  ;;  %v1970_v37 = vpack.i.bf16 %v3220_v34, %v3222_v35 }
 0x366   : > { %1951 = vrot.lane.b32.xlu0 %v1950_v36, %s3384_s2  ;;  %1946 = vrot.lane.b32.xlu1 %v1950_v36, %s2581_s19  ;;  %s1684_s19 = sshll.u32 %s3421_s21, 9  ;;  %s2589_s21 = smov [#allocation29]  }
 0x367   : > { %s2462_s2 = sshll.u32 %s2589_s21, 4  ;;  %s2463_s2 = int_to_ptr.vmem [resolvable:$false] %s2462_s2 }
 0x368   : > { %s2464_s5 = scalar_lea.vmem %s2463_s2, 1024  ;;  %p2465_p6 = scmp.lt.s32.totalorder %s3302_s23, %s2463_s2 }
 0x369   : > { %p2466_p9 = scmp.lt.s32.totalorder %s2464_s5, %s2458_s26 }
 0x36a   : > { %1961 = vrot.lane.b32.xlu0 %v1950_v36, %s2582_s27  ;;  %1956 = vrot.lane.b32.xlu1 %v1950_v36, %s2583_s0 }
 0x36b   : > { %p2467_p12 = por %p2466_p9, %p2465_p6 }
 0x36d   : > { %p2468_p13 = pnand %p2467_p12, %p2461_p7 }
 0x36e   : > { %1971 = vrot.lane.b32.xlu0 %v1970_v37, %s2584_s25  ;;  %1966 = vrot.lane.b32.xlu1 %v1970_v37, %s2585_s22  ;;  %s3448_s25 = sld [smem:[#allocation52_spill]] }
 0x372   : > { %1026 = vrot.lane.b32.xlu0 %v3222_v35, %s2586_s4  ;;  %1976 = vrot.lane.b32.xlu1 %v1950_v36, %s2587_s17  ;;  %s1374_s17 = scalar_lea.sflag [#allocation4], %s3163_s28 }
 0x374   : > { %s3449_s22 = smov %s3448_s25 }
 0x376   : > { %1039 = vperm.xlu0 %1943, %v1036_v38   ;;  %1024 = vrot.lane.b32.xlu1 %v3220_v34, %s2586_s4  ;;  %s3307_s4 = scalar_lea.hbm %s3448_s25, %s1684_s19 }
 0x37a   : > { %1128 = vperm.xlu0 %1943, %v1125_v39   ;;  %1120 = vperm.xlu1 %1944, %v1117_v40   ;;  %v1035_v39 = vld [vmem:[#allocation14] sm:$0xff] }
 0x37e   : > { %1250 = vperm.xlu0 %1943, %v1247_v41   ;;  %1236 = vperm.xlu1 %1944, %v1233_v42  }
 0x382   : > { %1146 = vperm.xlu0 %1943, %v1138_v43   ;;  %1141 = vperm.xlu1 %1944, %v1137_v44  }
 0x386   : > { %1273 = vperm.xlu0 %1943, %v1265_v45   ;;  %1268 = vperm.xlu1 %1944, %v1264_v46  }
 0x3d8   : > { %v1952_v51 = vpop.permute.xlu0 %1951  ;;  %v1947_v52 = vpop.permute.xlu1 %1946 }
 0x3d9   : > { %v1954_v55 = vunpack.i.h.bf16 %v1952_v51  ;;  %v1953_v56 = vunpack.i.l.bf16 %v1952_v51  ;;  %v1949_v57 = vunpack.i.h.bf16 %v1947_v52  ;;  %v1948_v58 = vunpack.i.l.bf16 %v1947_v52 }
 0x3db   : > { %v951_v60 = vsel %vm947_vm2, 0.0, %v1948_v58  ;;  %v948_v61 = vsel %vm947_vm2, %v1948_v58, %v1949_v57  ;;  %v963_v62 = vsel %vm962_vm4, %v1953_v56, %v1954_v55  ;;  %vm1695_vm2 = vmpackc.low %vm3236_vm5, %vm3255_vm13  ;;  %vm1008_vm4 = vcmask 924672  }
 0x3dc   : > { %v1962_v63 = vpop.permute.xlu0 %1961  ;;  %v1957_v0 = vpop.permute.xlu1 %1956  ;;  %v1685_v1 = vpack.c.bf16 %v963_v62, %v948_v61  ;;  %v1688_v2 = vpack.c.bf16 %v1953_v56, %v951_v60  ;;  %v1135_v61 = vld [vmem:[#allocation20] sm:$0xff] }
 0x3dd   : > { %v1964_v6 = vunpack.i.h.bf16 %v1962_v63  ;;  %v1963_v7 = vunpack.i.l.bf16 %v1962_v63  ;;  %v1959_v8 = vunpack.i.h.bf16 %v1957_v0  ;;  %v1958_v9 = vunpack.i.l.bf16 %v1957_v0  ;;  %v1263_v63 = vld [vmem:[#allocation26 + $0x8] sm:$0xff] }
 0x3de   : > { %1687 = vmatprep.subr.msk.bf16.mxu1 %vm1686_vm10, %v1685_v1 }
 0x3df   : > { %v987_v10 = vsel %vm986_vm7, %v1963_v7, %v1964_v6  ;;  %v990_v11 = vsel %vm986_vm7, 0.0, %v1963_v7  ;;  %v972_v13 = vsel %vm971_vm8, %v1958_v9, %v1959_v8  ;;  %v975_v14 = vsel %vm971_vm8, 0.0, %v1958_v9  ;;  %1690 = vmatpush1.bf16.msk.msra.mxu1 %vm1689_vm11, %v1688_v2  ;;  %vm1701_vm8 = vmpackc.low %vm3255_vm13, %vm2588_vm9 }
 0x3e0   : > { %v1691_v16 = vpack.c.bf16 %v987_v10, %v972_v13  ;;  %v1694_v17 = vpack.c.bf16 %v990_v11, %v975_v14  ;;  %v1972_v18 = vpop.permute.xlu0 %1971  ;;  %v1967_v19 = vpop.permute.xlu1 %1966  ;;  %vm1019_vm7 = vcmask 916480   ;;  %vm1028_vm11 = vcmask 908288  }
 0x3e1   : > { %v1969_v20 = vunpack.i.h.bf16 %v1967_v19  ;;  %v1968_v21 = vunpack.i.l.bf16 %v1967_v19  ;;  %v1973_v22 = vunpack.i.l.bf16 %v1972_v18  ;;  %v1974_v23 = vunpack.i.h.bf16 %v1972_v18  ;;  %vm1704_vm10 = vmpackc.low %vm1019_vm7, %vm3232_vm3 }
 0x3e2   : > { %1693 = vmatprep.subr.msk.bf16.mxu1 %vm1692_vm14, %v1691_v16  ;;  %vm1707_vm14 = vmpackc.low %vm2588_vm9, %vm3236_vm5  ;;  %vm1042_vm3 = vcmask 588800   ;;  %vm1149_vm5 = vcmask 64512  }
 0x3e3   : > { %v998_v24 = vsel %vm997_vm15, %v1969_v20, %v1968_v21  ;;  %v1001_v25 = vsel %vm997_vm15, %v1968_v21, 0.0  ;;  %1696 = vmatpush1.bf16.msk.msra.mxu1 %vm1695_vm2, %v1694_v17  ;;  %v1012_v31 = vsel %vm1008_vm4, %v1973_v22, 0.0  ;;  %v1009_v32 = vsel %vm1008_vm4, %v1974_v23, %v1973_v22 }
 0x3e4   : > { %v1697_v26 = vpack.c.bf16 %v1001_v25, %v3222_v35  ;;  %v1700_v27 = vpack.c.bf16 %v998_v24, %v3220_v34  ;;  %v1977_v28 = vpop.permute.xlu1 %1976  ;;  %v1027_v34 = vpop.permute.xlu0 %1026 }
 0x3e5   : > { %v1979_v29 = vunpack.i.h.bf16 %v1977_v28  ;;  %v1978_v30 = vunpack.i.l.bf16 %v1977_v28  ;;  %v1032_v37 = vsel %vm1028_vm11, %v1027_v34, 0.0 }
 0x3e6   : > { %1699 = vmatprep.subr.msk.bf16.mxu1 %vm1698_vm6, %v1697_v26 }
 0x3e7   : > { %v1703_v33 = vpack.c.bf16 %v1979_v29, %v1012_v31  ;;  %1702 = vmatpush1.bf16.msk.msra.mxu1 %vm1701_vm8, %v1700_v27  ;;  %v1020_v35 = vsel %vm1019_vm7, %v1978_v30, %v1979_v29 }
 0x3e8   : > { %v1706_v36 = vpack.c.bf16 %v1020_v35, %v1009_v32  ;;  %v1025_v38 = vpop.permute.xlu1 %1024 }
 0x3e9   : > { %1705 = vmatprep.subr.msk.bf16.mxu1 %vm1704_vm10, %v1703_v33  ;;  %v1029_v40 = vsel %vm1028_vm11, %v1025_v38, %v1027_v34 }
 0x3eb   : > { %1708 = vmatpush1.bf16.msk.msra.mxu1 %vm1707_vm14, %v1706_v36 }
 0x3ec   : > { %1669 = vmatprep.subr.msk.mxu1 %vm3251_vm12, %v1032_v37 }
 0x3ef   : > { %1670 = vmatpush1.msk.msra.mxu1 %vm3255_vm13, %v1029_v40 }
 0x3f0   : > { %1671 = vmatmul.mubr.msk.f32.vlgmr.msra.gmra.mrb[0].mxu1 %vm1042_vm3, %v1035_v39 }
 0x3f5   : > { %v1040_v41 = vpop.permute.xlu0 %1039 }
 0x3f9   : > { %v1121_v42 = vpop.permute.xlu1 %1120  ;;  %v1129_v43 = vpop.permute.xlu0 %1128 }
 0x3fd   : > { %v1237_v44 = vpop.permute.xlu1 %1236  ;;  %v1251_v46 = vpop.permute.xlu0 %1250 }
 0x3fe   : > { %v1244_v45 = vrot.slane %v1237_v44, %v3208_v12  ;;  %v1258_v48 = vrot.slane %v1251_v46, %v3208_v12  ;;  %v1136_v12 = vld [vmem:[#allocation20 + $0x8] sm:$0xff] }
 0x400   : > { %v1246_v47 = vmul.f32 %v1244_v45, %v3212_v15  ;;  %v1262_v15 = vld [vmem:[#allocation26] sm:$0xff] }
 0x401   : > { %v1142_v0 = vpop.permute.xlu1 %1141  ;;  %v1147_v1 = vpop.permute.xlu0 %1146 }
 0x402   : > { %v1260_v52 = vadd.f32 %v1258_v48, %v1246_v47 }
 0x404   : > { %v1261_v57 = vmax.f32 %v1260_v52, 0.0 }
 0x405   : > { %v1269_v2 = vpop.permute.xlu1 %1268  ;;  %v1274_v5 = vpop.permute.xlu0 %1273 }
 0x406   : > { %v1277_v62 = vcombine.high %v1261_v57, %v1261_v57  ;;  %v1709_v3 = vadd.f32 %v1269_v2, %v1142_v0  ;;  %v1713_v10 = vadd.f32 %v1274_v5, %v1147_v1 }
 0x4c3   : > { %v1112_v49 = vpop.f32.mrb[0].mxu1 }
 0x4c4   : > { %v1113_v50 = vadd.f32 %v1112_v49, %v1040_v41  ;;  %v1114_v51 = vpop.f32.mrb[1].mxu1 }
 0x4c5   : > { %v1115_v53 = vadd.f32 %v1114_v51, %v1040_v41 }
 0x4c6   : > { %v1123_v54 = vmul.f32 %v1121_v42, %v1113_v50 }
 0x4c7   : > { %v1124_v55 = vmul.f32 %v1121_v42, %v1115_v53 }
 0x4c8   : > { %v1131_v56 = vadd.f32 %v1129_v43, %v1123_v54 }
 0x4c9   : > { %v1132_v58 = vadd.f32 %v1129_v43, %v1124_v55 }
 0x4ca   : > { %v1133_v60 = vmax.f32 %v1131_v56, 0.0 }
 0x4cb   : > { %v1134_v59 = vmax.f32 %v1132_v58, 0.0 }
 0x4cd   : > { %1156 = vmatprep.subr.mxu0 %v1134_v59 }
 0x4ce   : > { %1157 = vmatpush1.msra.mxu0 %v1133_v60 }
 0x4cf   : > { %1672 = vmatmul.mubr.msk.f32.vlgmr.msra.gmra.mrb[2].mxu0 %vm1149_vm5, %v1135_v61  ;;  %1674 = vmatprep.subr.msk.mxu0 %vm816_vm0, %v1277_v62 }
 0x4d0   : > { %1675 = vmatpush1.msk.msra.mxu0 %vm816_vm0, %v1261_v57  ;;  %1226 = vmatprep.mubr.f32.mxu0 %v2578_v4 }
 0x4d3   : > { %1673 = vmatmul.mubr.msk.f32.gmra.mrb[4].mxu0 %vm1149_vm5, %v1136_v12 }
 0x4d4   : > { %1352 = vmatprep.mubr.f32.mxu0 %v2578_v4 }
 0x4d7   : > { %1676 = vmatmul.mubr.msk.f32.vlgmr.msra.gmra.mrb[2].mxu0 %vm812_vm1, %v1262_v15 }
 0x4d8   : > { %1358 = vmatprep.mubr.f32.mxu0 %v2578_v4 }
 0x4db   : > { %1677 = vmatmul.mubr.msk.f32.gmra.mrb[4].mxu0 %vm812_vm1, %v1263_v63 }
 0x5aa   : > { %v1354_v6 = vpop.f32.mrb[2].mxu0 }
 0x5ab   : > { %v1710_v7 = vadd.f32 %v1709_v3, %v1354_v6  ;;  %v1356_v8 = vpop.f32.mrb[3].mxu0 }
 0x5ac   : > { %v1712_v9 = vadd.f32 %v1709_v3, %v1356_v8 }
 0x5ad   : > { %1369 = vst [vmem:[%s772_s1] sm:$0xff] %v1710_v7 }
 0x5ae   : > { %1370 = vst [vmem:[%s772_s1 + $0x8] sm:$0xff] %v1712_v9  ;;  %v1360_v4 = vpop.f32.mrb[4].mxu0 }
 0x5af   : > { %v1714_v11 = vadd.f32 %v1713_v10, %v1360_v4  ;;  %v1362_v13 = vpop.f32.mrb[5].mxu0 }
 0x5b0   : > { %v1716_v14 = vadd.f32 %v1713_v10, %v1362_v13 }
 0x5b1   : > { %1371 = vst [vmem:[%s772_s1 + $0x10] sm:$0xff] %v1714_v11 }
 0x5b2   : > { %1372 = vst [vmem:[%s772_s1 + $0x18] sm:$0xff] %v1716_v14 }
 0x5b3   : > { %2471 = shalt.err (!%p2468_p13)
}
 0x5b4   : > { %s2472_s1 = scalar_lea.hbm %s3307_s4, 512  ;;  %s2476_s0 = scalar_lea.hbm %s3449_s22, 1024 }
 0x5b5   : > { %p2473_p1 = scmp.ne.s32.totalorder %s3307_s4, %s2472_s1  ;;  %p2477_p0 = scmp.lt.u32.totalorder %s3307_s4, %s3449_s22 }
 0x5b6   : > { %p2478_p10 = scmp.lt.u32.totalorder %s2476_s0, %s2472_s1  ;;  %p2480_p11 = scmp.lt.u32.totalorder %s2472_s1, %s3307_s4 }
 0x5b7   : > { %p2474_p3 = pnand %p2473_p1, %p3450_p8 }
 0x5b8   : > { %p2479_p4 = por %p2478_p10, %p2477_p0 }
 0x5b9   : > { %p2475_p2 = pneg %p2474_p3 }
 0x5ba   : > { %p2481_p5 = por %p2480_p11, %p2479_p4 }
 0x5bc   : > { %p2482_p7 = pnand %p2481_p5, %p2475_p2 }
 0x5be   : > { %2485 = shalt.err (!%p2482_p7)
}
 0x5bf   : > { %s2590_s5 = smov 256   ;;  %s3451_s26 = smov 16  }
 0x5c0   : > { %1787 = dma.vmem_to_hbm [thread:$0]  (%p3450_p8), %s3302_s23, 512, %s3307_s4, %s1374_s17, %s2590_s5, %s2590_s5, %s3451_s26  }
 0x5c1 PF: > { %s3452_s21 = sld [smem:[#allocation40_spill]]  ;;  %s3453_s19 = sld [smem:[#allocation43_spill]] }
 0x5c2   : > { %p3454_p6 = scmp.ne.s32.totalorder %s3415_s24, 0 }
 0x5c7   : > { %s1402_s27 = sand.u32 1, %s3452_s21   ;;  %p3455_p9 = scmp.ge.s32.totalorder %s3453_s19, 2 }
 0x5c8   : > { %s1403_s1 = scalar_lea.sflag [#allocation4], %s1402_s27 }
 0x5c9   : > { %p1843_p12 = pnand %p3455_p9, %p3454_p6 }
 0x5cb   : > { %2539 = dma.done.wait (!%p1843_p12), %s1403_s1, 512  }
 0x5cc   : > { %2541 = vsyncadd (!%p1843_p12), %s1403_s1, 4294966784  ;;  %s3456_s24 = sld [smem:[#allocation41_spill]]  ;;  %s3457_s25 = sld [smem:[#allocation42_spill]] }
 0x5cd   : > { %p38_p13 = scmp.ge.s32.totalorder %s3087_s20, 4   ;;  %s3458_s26 = smov %s3098_s29 }
 0x5ce   : > { %s3459_s27 = smov %s3087_s20 }
 0x5cf   :  { %40 = sbr.rel (!%p38_p13) target bundleno = 21 (0x15), region = 197 }
 0x5d6   :  { %1408 = vsyncpa [#allocation3], 1 }
 0x5d7   :  { %1410 = vsyncpa [#allocation3 + $0x1], 1 }
 0x5d8   :  { %1411 = vsyncpa [#allocation6], 1 }
 0x5d9   :  { %1412 = vsyncpa [#allocation9], 1 }
 0x5da   :  { %1413 = vsyncpa [#allocation12], 1 }
 0x5db   :  { %1414 = vsyncpa [#allocation15], 1 }
 0x5dc   :  { %1415 = vsyncpa [#allocation18], 1 }
 0x5dd   :  { %1416 = vsyncpa [#allocation21], 1 }
 0x5de   :  { %1417 = vsyncpa [#allocation24], 1 }
 0x5df   :  { %1418 = vsyncpa [#allocation27], 1 }
 0x5e0   :  { %1419 = vsyncpa [#allocation4], 1 }
 0x5e1   :  { %1421 = vsyncpa [#allocation4 + $0x1], 1 }

</bundles_post_ra>
